<compile_context>
chip_gen: v7x
topology: tpu7x:2x2x1
jax: 0.10.0
libtpu: 0.0.40
codegen_flags: <defaults>
</compile_context>

<pallas_src>
import jax
import jax.numpy as jnp
from jax import lax
from jax.experimental import pallas as pl
from jax.experimental.pallas import tpu as pltpu

_LANE = 128
_SUBLANE = 8


def _round_up(v, m):
    return -(-v // m) * m


def _outer_product_kernel(x_ref, w_ref, e1_ref, e2_ref, o_ref, phi_ref):
    # x_ref  : (TN, D)            VMEM
    # w_ref  : (D, F1p + F2p)     VMEM   packed [W1 | 0 | W2 | 0]
    # e1_ref : (F1p, TC)          VMEM   0/1 "repeat" matrix for this col tile
    # e2_ref : (F2p, TC)          VMEM   0/1 "tile"   matrix for this col tile
    # o_ref  : (TN, TC)           VMEM
    # phi_ref: (TN, F1p + F2p)    VMEM scratch (f32), persists across col steps
    f1p = e1_ref.shape[0]

    # phi = x @ [W1 | W2] depends only on the row tile; compute it once per
    # row tile (column axis is "arbitrary" -> sequential, scratch carries).
    @pl.when(pl.program_id(1) == 0)
    def _():
        phi_ref[...] = jnp.dot(
            x_ref[...], w_ref[...],
            preferred_element_type=jnp.float32,
            precision=lax.Precision.HIGHEST,
        )

    # Lane-aligned static slices (f1p is a multiple of 128).
    phi1 = phi_ref[:, :f1p]
    phi2 = phi_ref[:, f1p:]
    # Expand to the flattened outer-product layout on the MXU (avoids any
    # cross-lane gather/relayout), then one multiply + one lane-dense store.
    left = jnp.dot(phi1, e1_ref[...], preferred_element_type=jnp.float32,
                   precision=lax.Precision.HIGHEST)
    right = jnp.dot(phi2, e2_ref[...], preferred_element_type=jnp.float32,
                    precision=lax.Precision.HIGHEST)
    o_ref[...] = (left * right).astype(o_ref.dtype)


def outer_product_feature_map(x, w1, w2, *, max_tile_n=4096, max_tile_c=2048,
                              out_dtype=None,
                              vmem_budget_bytes=24 * 1024 * 1024):
    """x: [..., D]; w1: [D, F1]; w2: [D, F2] -> [..., F1*F2] (flattened outer product)."""
    batch_shape = x.shape[:-1]
    d = x.shape[-1]
    x2 = x.reshape(-1, d)
    n = x2.shape[0]
    d1, f1 = w1.shape
    d2, f2 = w2.shape
    assert d1 == d and d2 == d
    out_dim = f1 * f2
    out_dtype = x.dtype if out_dtype is None else jnp.dtype(out_dtype)
    compute_dtype = x.dtype

    # ---- lane-pad feature widths so slices / stores are lane-dense ---------
    f1_pad = _round_up(f1, _LANE)
    f2_pad = _round_up(f2, _LANE)
    w_cols = f1_pad + f2_pad

    out_pad = _round_up(out_dim, _LANE)
    n_ctiles = -(-out_pad // max_tile_c)
    tile_c = _round_up(-(-out_pad // n_ctiles), _LANE)
    out_pad = tile_c * n_ctiles

    # ---- packed weights + 0/1 expansion matrices (cacheable across calls) --
    # TODO(synk): hoist/cache these for callers that reuse the same W1/W2.
    w_comb = jnp.zeros((d, w_cols), compute_dtype)
    w_comb = w_comb.at[:, :f1].set(w1.astype(compute_dtype))
    w_comb = w_comb.at[:, f1_pad:f1_pad + f2].set(w2.astype(compute_dtype))

    cols = jnp.arange(out_pad)
    valid = cols < out_dim
    e1 = ((jnp.arange(f1_pad)[:, None] == (cols // f2)[None, :])
          & valid[None, :]).astype(compute_dtype)          # (F1p, out_pad)
    e2 = ((jnp.arange(f2_pad)[:, None] == (cols % f2)[None, :])
          & valid[None, :]).astype(compute_dtype)          # (F2p, out_pad)

    # ---- VMEM-budget-aware row tile ----------------------------------------
    itemsize_in = jnp.dtype(compute_dtype).itemsize
    itemsize_out = jnp.dtype(out_dtype).itemsize
    d_lanes = _round_up(d, _LANE)  # x tile occupies lane-padded width in VMEM
    fixed_bytes = (
        2 * _round_up(d, _SUBLANE) * w_cols * itemsize_in          # w_comb
        + 2 * _round_up(f1_pad, _SUBLANE) * tile_c * itemsize_in   # e1 block
        + 2 * _round_up(f2_pad, _SUBLANE) * tile_c * itemsize_in   # e2 block
    )

    def _tile_bytes(t):
        return (2 * t * d_lanes * itemsize_in       # x tile (double-buffered)
                + 2 * t * tile_c * itemsize_out     # out tile (double-buffered)
                + t * w_cols * 4                    # phi scratch (f32)
                + 2 * t * tile_c * 4)               # left/right f32 headroom

    n_rows = max(_SUBLANE, _round_up(n, _SUBLANE))
    tile_n = min(_round_up(max_tile_n, _SUBLANE), n_rows)
    while tile_n > _SUBLANE and fixed_bytes + _tile_bytes(tile_n) > vmem_budget_bytes:
        tile_n = max(_SUBLANE, (tile_n // 2 // _SUBLANE) * _SUBLANE)

    n_full = _round_up(max(n, 1), tile_n)
    x_in = x2 if n_full == n else jnp.pad(x2, ((0, n_full - n), (0, 0)))

    grid = (n_full // tile_n, n_ctiles)

    need_bytes = fixed_bytes + _tile_bytes(tile_n)
    vmem_limit = int(min(48 * 1024 * 1024,
                         max(16 * 1024 * 1024, need_bytes + 2 * 1024 * 1024)))

    cost = pl.CostEstimate(
        flops=(2 * n_full * d * w_cols
               + 2 * n_full * (f1_pad + f2_pad) * out_pad
               + n_full * out_pad),
        transcendentals=0,
        bytes_accessed=(x_in.size * x_in.dtype.itemsize
                        + w_comb.size * itemsize_in
                        + (e1.size + e2.size) * itemsize_in
                        + n_full * out_pad * itemsize_out),
    )

    out = pl.pallas_call(
        _outer_product_kernel,
        out_shape=jax.ShapeDtypeStruct((n_full, out_pad), out_dtype),
        grid_spec=pl.GridSpec(
            grid=grid,
            in_specs=[
                pl.BlockSpec((tile_n, d), lambda i, j: (i, 0)),
                pl.BlockSpec((d, w_cols), lambda i, j: (0, 0)),
                pl.BlockSpec((f1_pad, tile_c), lambda i, j: (0, j)),
                pl.BlockSpec((f2_pad, tile_c), lambda i, j: (0, j)),
            ],
            out_specs=pl.BlockSpec((tile_n, tile_c), lambda i, j: (i, j)),
            scratch_shapes=[pltpu.VMEM((tile_n, w_cols), jnp.float32)],
        ),
        compiler_params=pltpu.CompilerParams(
            # Row tiles are independent -> "parallel" (megacore sharding);
            # column tiles reuse the per-row phi scratch -> "arbitrary".
            # TODO(synk): verify 2-TC sharding on v7x; use CORE_PARALLEL if not.
            dimension_semantics=("parallel", "arbitrary"),
            vmem_limit_bytes=vmem_limit,
        ),
        cost_estimate=cost,
    )(x_in, w_comb, e1, e2)

    return out[:n, :out_dim].reshape(*batch_shape, out_dim)


if __name__ == "__main__":
    # Small, deterministic shapes: N=64 inputs of dim D=8,
    # two linear feature maps with F1=8 and F2=16 features -> 128 outputs.
    N, D, F1, F2 = 64, 8, 8, 16

    key = jax.random.PRNGKey(0)
    kx, k1, k2 = jax.random.split(key, 3)
    x = jax.random.normal(kx, (N, D), dtype=jnp.float32)
    w1 = jax.random.normal(k1, (D, F1), dtype=jnp.float32)
    w2 = jax.random.normal(k2, (D, F2), dtype=jnp.float32)

    out = outer_product_feature_map(x, w1, w2)
    out = jax.block_until_ready(out)

    # Pure-JAX reference of the PyTorch forward.
    phi1 = jnp.dot(x, w1, precision=lax.Precision.HIGHEST)
    phi2 = jnp.dot(x, w2, precision=lax.Precision.HIGHEST)
    ref = (phi1[:, :, None] * phi2[:, None, :]).reshape(N, F1 * F2)

    assert out.shape == (N, F1 * F2), out.shape
    assert jnp.allclose(out, ref, rtol=1e-4, atol=1e-4), float(
        jnp.max(jnp.abs(out - ref))
    )

    # Second check: ragged shapes (N not multiple of 8, F1*F2 not multiple
    # of 128) exercise the row + lane padding paths.
    N2, F1b, F2b = 37, 3, 5
    xb = jax.random.normal(kx, (N2, D), dtype=jnp.float32)
    w1b = jax.random.normal(k1, (D, F1b), dtype=jnp.float32)
    w2b = jax.random.normal(k2, (D, F2b), dtype=jnp.float32)
    outb = jax.block_until_ready(outer_product_feature_map(xb, w1b, w2b))
    p1 = jnp.dot(xb, w1b, precision=lax.Precision.HIGHEST)
    p2 = jnp.dot(xb, w2b, precision=lax.Precision.HIGHEST)
    refb = (p1[:, :, None] * p2[:, None, :]).reshape(N2, F1b * F2b)
    assert outb.shape == (N2, F1b * F2b), outb.shape
    assert jnp.allclose(outb, refb, rtol=1e-4, atol=1e-4), float(
        jnp.max(jnp.abs(outb - refb))
    )

    print("KERNEL_OK")
</pallas_src>

<mosaic_0001>
module attributes {stable_mosaic.version = 11 : i64} {
  func.func @_outer_product_kernel(%arg0: i32, %arg1: i32, %arg2: memref<64x8xf32, #tpu.memory_space<vmem>>, %arg3: memref<8x256xf32, #tpu.memory_space<vmem>>, %arg4: memref<128x128xf32, #tpu.memory_space<vmem>>, %arg5: memref<128x128xf32, #tpu.memory_space<vmem>>, %arg6: memref<64x128xf32, #tpu.memory_space<vmem>>, %arg7: memref<64x256xf32, #tpu.memory_space<vmem>>) attributes {dimension_semantics = [#tpu.dimension_semantics<parallel>, #tpu.dimension_semantics<arbitrary>], iteration_bounds = array<i64: 1, 1>, scalar_prefetch = 0 : i64, scratch_operands = 1 : i64, tpu.core_type = #tpu.core_type<tc>, window_params = [{transform_indices = @transform_0, window_bounds = array<i64: 64, 8>}, {pipeline_mode = #tpu.pipeline_mode<synchronous>, transform_indices = @transform_1, window_bounds = array<i64: 8, 256>}, {transform_indices = @transform_2, window_bounds = array<i64: 128, 128>}, {transform_indices = @transform_3, window_bounds = array<i64: 128, 128>}, {transform_indices = @transform_4, window_bounds = array<i64: 64, 128>}]} {
    %c0_i32 = arith.constant 0 : i32
    %0 = arith.cmpi eq, %arg1, %c0_i32 : i32
    %1 = arith.extui %0 : i1 to i32
    %c0_i32_0 = arith.constant 0 : i32
    %2 = arith.cmpi ne, %1, %c0_i32_0 : i32
    scf.if %2 {
      %c0_10 = arith.constant 0 : index
      %c0_11 = arith.constant 0 : index
      %11 = vector.load %arg2[%c0_10, %c0_11] : memref<64x8xf32, #tpu.memory_space<vmem>>, vector<64x8xf32>
      %c0_12 = arith.constant 0 : index
      %c0_13 = arith.constant 0 : index
      %12 = vector.load %arg3[%c0_12, %c0_13] : memref<8x256xf32, #tpu.memory_space<vmem>>, vector<8x256xf32>
      %cst_14 = arith.constant dense<0.000000e+00> : vector<64x256xf32>
      %13 = tpu.matmul %11, %12, %cst_14 {dimension_numbers = #tpu.dot_dimension_numbers<[1], [0], [0], [1], [0, 0, 1, 1], [], []>, precision = #tpu.contract_precision<fp32>} : vector<64x8xf32>, vector<8x256xf32>, vector<64x256xf32> -> vector<64x256xf32>
      %c0_15 = arith.constant 0 : index
      %c0_16 = arith.constant 0 : index
      %14 = vector.load %arg7[%c0_15, %c0_16] : memref<64x256xf32, #tpu.memory_space<vmem>>, vector<64x256xf32>
      tpu.vector_store %arg7[%c0_15, %c0_16], %13 {strides = array<i32>} : memref<64x256xf32, #tpu.memory_space<vmem>>, vector<64x256xf32>,
    } else {
    }
    %c0 = arith.constant 0 : index
    %c0_1 = arith.constant 0 : index
    %3 = vector.load %arg7[%c0, %c0_1] : memref<64x256xf32, #tpu.memory_space<vmem>>, vector<64x128xf32>
    %c0_2 = arith.constant 0 : index
    %c128 = arith.constant 128 : index
    %4 = vector.load %arg7[%c0_2, %c128] : memref<64x256xf32, #tpu.memory_space<vmem>>, vector<64x128xf32>
    %c0_3 = arith.constant 0 : index
    %c0_4 = arith.constant 0 : index
    %5 = vector.load %arg4[%c0_3, %c0_4] : memref<128x128xf32, #tpu.memory_space<vmem>>, vector<128x128xf32>
    %cst = arith.constant dense<0.000000e+00> : vector<64x128xf32>
    %6 = tpu.matmul %3, %5, %cst {dimension_numbers = #tpu.dot_dimension_numbers<[1], [0], [0], [1], [0, 0, 1, 1], [], []>, precision = #tpu.contract_precision<fp32>} : vector<64x128xf32>, vector<128x128xf32>, vector<64x128xf32> -> vector<64x128xf32>
    %c0_5 = arith.constant 0 : index
    %c0_6 = arith.constant 0 : index
    %7 = vector.load %arg5[%c0_5, %c0_6] : memref<128x128xf32, #tpu.memory_space<vmem>>, vector<128x128xf32>
    %cst_7 = arith.constant dense<0.000000e+00> : vector<64x128xf32>
    %8 = tpu.matmul %4, %7, %cst_7 {dimension_numbers = #tpu.dot_dimension_numbers<[1], [0], [0], [1], [0, 0, 1, 1], [], []>, precision = #tpu.contract_precision<fp32>} : vector<64x128xf32>, vector<128x128xf32>, vector<64x128xf32> -> vector<64x128xf32>
    %9 = arith.mulf %6, %8 : vector<64x128xf32>
    %c0_8 = arith.constant 0 : index
    %c0_9 = arith.constant 0 : index
    %10 = vector.load %arg6[%c0_8, %c0_9] : memref<64x128xf32, #tpu.memory_space<vmem>>, vector<64x128xf32>
    tpu.vector_store %arg6[%c0_8, %c0_9], %9 {strides = array<i32>} : memref<64x128xf32, #tpu.memory_space<vmem>>, vector<64x128xf32>,
    return
  }
  func.func @transform_0(%arg0: i32, %arg1: i32) -> (i32, i32) {
    %c0_i32 = arith.constant 0 : i32
    %c0_i32_0 = arith.constant 0 : i32
    return %arg0, %c0_i32 : i32, i32
  }
  func.func @transform_1(%arg0: i32, %arg1: i32) -> (i32, i32) {
    %c0_i32 = arith.constant 0 : i32
    %c0_i32_0 = arith.constant 0 : i32
    %c0_i32_1 = arith.constant 0 : i32
    return %c0_i32, %c0_i32_0 : i32, i32
  }
  func.func @transform_2(%arg0: i32, %arg1: i32) -> (i32, i32) {
    %c0_i32 = arith.constant 0 : i32
    %c0_i32_0 = arith.constant 0 : i32
    return %c0_i32, %arg1 : i32, i32
  }
  func.func @transform_3(%arg0: i32, %arg1: i32) -> (i32, i32) {
    %c0_i32 = arith.constant 0 : i32
    %c0_i32_0 = arith.constant 0 : i32
    return %c0_i32, %arg1 : i32, i32
  }
  func.func @transform_4(%arg0: i32, %arg1: i32) -> (i32, i32) {
    %c0_i32 = arith.constant 0 : i32
    return %arg0, %arg1 : i32, i32
  }
}

</mosaic_0001>

<bundles_post_ra>
// kernel: tpu_custom_call.1
= control target key start
LH: loop header
LB: loop body
LE: loop exit
PB: predicated region body
PF: predicated region fallthrough
CT: control target
= control target key end

     0   :  { %9 = vsyncpa [#allocation4], 0  ;;  %s5590_s0 = inlined_call_operand.vmem [shape: f32[64,8], index: 0, kind: input, shape index: {}]   ;;  %s5591_s1 = inlined_call_operand.vmem [shape: f32[8,256], index: 1, kind: input, shape index: {}]   ;;  %s5592_s2 = inlined_call_operand.hbm [shape: f32[128,128], index: 2, kind: input, shape index: {}]   ;;  %s5593_s3 = inlined_call_operand.hbm [shape: f32[128,128], index: 3, kind: input, shape index: {}]   ;;  %s5594_s4 = inlined_call_operand.hbm [shape: f32[64,128], index: 4, kind: output, shape index: {}]  }
   0x1   :  { %10 = vsyncpa [#allocation7], 0 }
   0x2   :  { %11 = vsyncpa [#allocation5], 0  ;;  %s4313_s15 = smov [#allocation3]   ;;  %s4241_s19 = scalar_lea.hbm %s5592_s2, 2048 }
   0x3   :  { %s21_s16 = sshll.u32 %s4313_s15, 4  ;;  %p4242_p0 = scmp.ne.s32.totalorder %s5592_s2, %s4241_s19  ;;  %s22_s16 = int_to_ptr.vmem [resolvable:$true] %s21_s16 }
   0x4   :  { %p4245_p1 = scmp.lt.u32.totalorder %s4241_s19, %s5592_s2 }
   0x6   :  { %p4247_p2 = pnand %p4245_p1, %p4242_p0 }
   0x8   :  { %4250 = shalt.err (!%p4247_p2)
}
   0x9   :  { %s4251_s24 = scalar_lea.vmem %s22_s16, 2048  ;;  %p4256_p4 = scmp.lt.s32.totalorder %s22_s16, %s22_s16 }
   0xa   :  { %p4252_p3 = scmp.ne.s32.totalorder %s22_s16, %s4251_s24  ;;  %p4257_p5 = scmp.lt.s32.totalorder %s4251_s24, %s4251_s24 }
   0xc   :  { %p4258_p6 = por %p4257_p5, %p4256_p4 }
   0xe   :  { %p4259_p7 = pnand %p4258_p6, %p4252_p3 }
  0x10   :  { %4262 = shalt.err (!%p4259_p7)
}
  0x11   :  { %s4314_s25 = smov 128   ;;  %s4315_s26 = smov 8  }
  0x12   :  { %27 = dma.hbm_to_vmem [thread:$0]  %s5592_s2, 2048, %s22_s16, [#allocation4], %s4314_s25, %s4314_s25, %s4315_s26  }
  0x13   :  { %s4316_s29 = smov [#allocation6]   ;;  %s4263_s7 = scalar_lea.hbm %s5593_s3, 2048 }
  0x14   :  { %s33_s30 = sshll.u32 %s4316_s29, 4  ;;  %p4264_p8 = scmp.ne.s32.totalorder %s5593_s3, %s4263_s7  ;;  %s34_s30 = int_to_ptr.vmem [resolvable:$true] %s33_s30 }
  0x15   :  { %p4267_p9 = scmp.lt.u32.totalorder %s4263_s7, %s5593_s3 }
  0x17   :  { %p4269_p10 = pnand %p4267_p9, %p4264_p8 }
  0x19   :  { %4272 = shalt.err (!%p4269_p10)
}
  0x1a   :  { %s4273_s12 = scalar_lea.vmem %s34_s30, 2048  ;;  %p4278_p12 = scmp.lt.s32.totalorder %s34_s30, %s34_s30 }
  0x1b   :  { %p4274_p11 = scmp.ne.s32.totalorder %s34_s30, %s4273_s12  ;;  %p4279_p13 = scmp.lt.s32.totalorder %s4273_s12, %s4273_s12 }
  0x1d   :  { %p4280_p0 = por %p4279_p13, %p4278_p12 }
  0x1f   :  { %p4281_p1 = pnand %p4280_p0, %p4274_p11 }
  0x21   :  { %4284 = shalt.err (!%p4281_p1)
}
  0x22   :  { %39 = dma.hbm_to_vmem [thread:$0]  %s5593_s3, 2048, %s34_s30, [#allocation7], %s4314_s25, %s4314_s25, %s4315_s26  }
  0x23   :  { %4307 = dma.done.wait [#allocation4], 2048  }
  0x24   :  { %4308 = vsyncadd [#allocation4], 4294965248 }
  0x25   :  { %4309 = dma.done.wait [#allocation7], 2048  }
  0x26   :  { %4310 = vsyncadd [#allocation7], 4294965248  ;;  %v4317_v0 = vmov 0.0   ;;  %vm60_vm0 = vcmask 64512   ;;  %v59_v1 = vld [vmem:[%s5591_s1 + $0x8] sm:$0xff]  ;;  %v58_v2 = vld [vmem:[%s5591_s1] sm:$0xff] }
  0x27   :  { %570 = vmatprep.mubr.f32.mxu0 %v4317_v0  ;;  %151 = vmatprep.mubr.f32.mxu1 %v4317_v0  ;;  %v50_v3 = vld [vmem:[%s5590_s0] sm:$0xff]  ;;  %v85_v4 = vand.u32 4294901760, %v59_v1  ;;  %v4385_v5 = vand.u32 4294901760, %v58_v2  ;;  %v51_v7 = vld [vmem:[%s5590_s0 + $0x8] sm:$0xff]  ;;  %v52_v8 = vld [vmem:[%s5590_s0 + $0x10] sm:$0xff] }
  0x28   :  { %v62_v6 = vsel %vm60_vm0, %v50_v3, 0  ;;  %v53_v9 = vld [vmem:[%s5590_s0 + $0x18] sm:$0xff]  ;;  %v65_v11 = vsel %vm60_vm0, %v51_v7, 0  ;;  %v68_v12 = vsel %vm60_vm0, %v52_v8, 0  ;;  %v54_v14 = vld [vmem:[%s5590_s0 + $0x20] sm:$0xff]  ;;  %v55_v22 = vld [vmem:[%s5590_s0 + $0x28] sm:$0xff] }
  0x29   :  { %v4397_v10 = vand.u32 4294901760, %v62_v6  ;;  %v71_v13 = vsel %vm60_vm0, %v53_v9, 0  ;;  %505 = vmatprep.subr.mxu0 %v85_v4  ;;  %v4406_v15 = vsub.f32 %v58_v2, %v4385_v5  ;;  %86 = vmatprep.subr.mxu1 %v85_v4  ;;  %v241_v16 = vsub.f32 %v59_v1, %v85_v4  ;;  %v56_v40 = vld [vmem:[%s5590_s0 + $0x30] sm:$0xff]  ;;  %v57_v47 = vld [vmem:[%s5590_s0 + $0x38] sm:$0xff]  ;;  %s4318_s0 = smov [#allocation8]  }
  0x2a   :  { %v4408_v17 = vand.u32 4294901760, %v65_v11  ;;  %v4410_v18 = vand.u32 4294901760, %v68_v12  ;;  %507 = vmatpush1.msra.mxu0 %v4385_v5  ;;  %88 = vmatpush1.msra.mxu1 %v4385_v5  ;;  %v4417_v20 = vand.u32 4294901760, %v71_v13  ;;  %v74_v21 = vsel %vm60_vm0, %v54_v14, 0  ;;  %v4492_v7 = vld [vmem:[#allocation6 + $0x8] sm:$0xff]  ;;  %v4496_v8 = vld [vmem:[#allocation3] sm:$0xff] }
  0x2b   :  { %v4414_v19 = vsub.f32 %v62_v6, %v4397_v10  ;;  %v242_v23 = vand.u32 4294901760, %v241_v16  ;;  %v248_v24 = vand.u32 4294901760, %v4406_v15  ;;  %v77_v31 = vsel %vm60_vm0, %v55_v22, 0  ;;  %v4490_v6 = vld [vmem:[#allocation6] sm:$0xff]  ;;  %v4498_v9 = vld [vmem:[#allocation3 + $0x8] sm:$0xff]  ;;  %s2862_s8 = sshll.u32 %s4318_s0, 4  ;;  %s2863_s8 = int_to_ptr.vmem [resolvable:$true] %s2862_s8 }
  0x2c   :  { %v4425_v25 = vsub.f32 %v65_v11, %v4408_v17  ;;  %v4428_v26 = vsub.f32 %v68_v12, %v4410_v18  ;;  %v4437_v34 = vsub.f32 %v71_v13, %v4417_v20  ;;  %v4439_v35 = vand.u32 4294901760, %v74_v21  ;;  %s4285_s9 = scalar_lea.vmem %s2863_s8, 1024  ;;  %p4290_p3 = scmp.lt.s32.totalorder %s2863_s8, %s2863_s8 }
  0x2d   :  { %v154_v27 = vand.u32 4294901760, %v4414_v19  ;;  %v243_v28 = vsub.f32 %v241_v16, %v242_v23  ;;  %646 = vmatprep.subr.mxu0 %v242_v23  ;;  %v249_v29 = vsub.f32 %v4406_v15, %v248_v24  ;;  %v4446_v41 = vand.u32 4294901760, %v77_v31  ;;  %v4553_v23 = vld [vmem:[#allocation3 + $0x10] sm:$0xff]  ;;  %p4286_p2 = scmp.ne.s32.totalorder %s2863_s8, %s4285_s9  ;;  %p4291_p4 = scmp.lt.s32.totalorder %s4285_s9, %s4285_s9 }
  0x2e   :  { %v165_v30 = vand.u32 4294901760, %v4425_v25  ;;  %v176_v33 = vand.u32 4294901760, %v4428_v26  ;;  %v187_v44 = vand.u32 4294901760, %v4437_v34  ;;  %v4451_v45 = vsub.f32 %v74_v21, %v4439_v35 }
  0x2f   :  { %574 = vmatmul.mubr.f32.vlgmr.msra.gmra.mrb[0].mxu0 %v154_v27  ;;  %v155_v32 = vsub.f32 %v4414_v19, %v154_v27  ;;  %v244_v36 = vand.u32 4294901760, %v243_v28  ;;  %v250_v37 = vand.u32 4294901760, %v249_v29  ;;  %v80_v46 = vsel %vm60_vm0, %v56_v40, 0  ;;  %v4559_v28 = vld [vmem:[#allocation3 + $0x18] sm:$0xff]  ;;  %v4561_v29 = vld [vmem:[#allocation6 + $0x20] sm:$0xff]  ;;  %p4292_p5 = por %p4291_p4, %p4290_p3 }
  0x30   :  { %579 = vmatprep.mubr.f32.mxu0 %v4317_v0  ;;  %650 = vmatpush1.msra.mxu0 %v248_v24  ;;  %v166_v38 = vsub.f32 %v4425_v25, %v165_v30  ;;  %v177_v43 = vsub.f32 %v4428_v26, %v176_v33  ;;  %v4460_v48 = vsub.f32 %v77_v31, %v4446_v41  ;;  %v198_v51 = vand.u32 4294901760, %v4451_v45 }
  0x31   :  { %v156_v39 = vand.u32 4294901760, %v155_v32  ;;  %771 = vmatprep.subr.mxu0 %v85_v4  ;;  %245 = vmatprep.subr.mxu1 %v244_v36  ;;  %v188_v50 = vsub.f32 %v4437_v34, %v187_v44  ;;  %v4464_v52 = vand.u32 4294901760, %v80_v46  ;;  %v83_v53 = vsel %vm60_vm0, %v57_v47, 0  ;;  %p4293_p6 = pnand %p4292_p5, %p4286_p2 }
  0x32   :  { %v167_v42 = vand.u32 4294901760, %v166_v38  ;;  %v178_v49 = vand.u32 4294901760, %v177_v43  ;;  %v209_v54 = vand.u32 4294901760, %v4460_v48  ;;  %v199_v56 = vsub.f32 %v4451_v45, %v198_v51  ;;  %v4579_v38 = vld [vmem:[#allocation3 + $0x20] sm:$0xff] }
  0x33   :  { %157 = vmatmul.mubr.f32.vlgmr.msra.gmra.mrb[0].mxu1 %v156_v39  ;;  %583 = vmatmul.mubr.f32.gmra.mrb[2].mxu0 %v165_v30  ;;  %v189_v55 = vand.u32 4294901760, %v188_v50  ;;  %v4472_v57 = vsub.f32 %v80_v46, %v4464_v52  ;;  %v4474_v58 = vand.u32 4294901760, %v83_v53  ;;  %v1900_v11 = vand.u32 4294901760, %v4490_v6  ;;  %v4563_v30 = vld [vmem:[#allocation6 + $0x28] sm:$0xff] }
  0x34   :  { %251 = vmatpush1.msra.mxu1 %v250_v37  ;;  %162 = vmatprep.mubr.f32.mxu1 %v4317_v0  ;;  %v200_v59 = vand.u32 4294901760, %v199_v56  ;;  %v210_v60 = vsub.f32 %v4460_v48, %v209_v54  ;;  %v1903_v12 = vand.u32 4294901760, %v4492_v7  ;;  %v942_v14 = vand.u32 4294901760, %v4496_v8  ;;  %v4581_v39 = vld [vmem:[#allocation3 + $0x28] sm:$0xff]  ;;  %v4697_v56 = vld [vmem:[#allocation3 + $0x58] sm:$0xff] }
  0x35   :  { %588 = vmatprep.mubr.f32.mxu0 %v4317_v0  ;;  %373 = vmatprep.subr.mxu1 %v241_v16  ;;  %v220_v61 = vand.u32 4294901760, %v4472_v57  ;;  %v4481_v62 = vsub.f32 %v83_v53, %v4474_v58  ;;  %v945_v16 = vand.u32 4294901760, %v4498_v9  ;;  %v5602_v31 = vand.u32 4294901760, %v4553_v23  ;;  %v4669_v46 = vld [vmem:[#allocation3 + $0x48] sm:$0xff] }
  0x36   :  { %v211_v63 = vand.u32 4294901760, %v210_v60  ;;  %v4510_v21 = vpack.c.bf16 %v1903_v12, %v1900_v11  ;;  %v5601_v32 = vand.u32 4294901760, %v4559_v28  ;;  %v5596_v36 = vand.u32 4294901760, %v4561_v29  ;;  %v4676_v50 = vld [vmem:[#allocation6 + $0x48] sm:$0xff]  ;;  %v4704_v60 = vld [vmem:[#allocation6 + $0x58] sm:$0xff] }
  0x37   :  { %168 = vmatmul.mubr.f32.gmra.mrb[2].mxu1 %v167_v42  ;;  %592 = vmatmul.mubr.f32.gmra.mrb[4].mxu0 %v176_v33  ;;  %v221_v1 = vsub.f32 %v4472_v57, %v220_v61  ;;  %v231_v2 = vand.u32 4294901760, %v4481_v62  ;;  %v4520_v22 = vpack.c.bf16 %v945_v16, %v942_v14  ;;  %v5595_v37 = vand.u32 4294901760, %v4563_v30 }
  0x38   :  { %173 = vmatprep.mubr.f32.mxu1 %v4317_v0  ;;  %597 = vmatprep.mubr.f32.mxu0 %v4317_v0  ;;  %5724 = vst [vmem:[#allocation12_spill] sm:$0xff] %v4510_v21  ;;  %v4590_v40 = vpack.c.bf16 %v5601_v32, %v5602_v31  ;;  %v5597_v42 = vand.u32 4294901760, %v4581_v39  ;;  %v4753_v32 = vsub.f32 %v4498_v9, %v945_v16  ;;  %v4770_v9 = vld [vmem:[#allocation6 + $0x78] sm:$0xff] }
  0x39   :  { %v222_v3 = vand.u32 4294901760, %v221_v1  ;;  %v232_v4 = vsub.f32 %v4481_v62, %v231_v2  ;;  %5725 = vst [vmem:[#allocation13_spill] sm:$0xff] %v4520_v22  ;;  %v4599_v43 = vpack.c.bf16 %v5595_v37, %v5596_v36  ;;  %v4730_v37 = vld [vmem:[#allocation6 + $0x60] sm:$0xff]  ;;  %v4732_v36 = vld [vmem:[#allocation6 + $0x68] sm:$0xff] }
  0x3a   :  { %5727 = vst [vmem:[#allocation15_spill] sm:$0xff] %v4590_v40  ;;  %5738 = vst [vmem:[#allocation26_spill] sm:$0xff] %v4753_v32 }
  0x3b   :  { %179 = vmatmul.mubr.f32.gmra.mrb[4].mxu1 %v178_v49  ;;  %601 = vmatmul.mubr.f32.gmra.mrb[6].mxu0 %v187_v44  ;;  %v233_v13 = vand.u32 4294901760, %v232_v4  ;;  %5728 = vst [vmem:[#allocation16_spill] sm:$0xff] %v4599_v43  ;;  %v4674_v49 = vld [vmem:[#allocation6 + $0x40] sm:$0xff] }
  0x3c   :  { %184 = vmatprep.mubr.f32.mxu1 %v4317_v0  ;;  %606 = vmatprep.mubr.f32.mxu0 %v4317_v0 }
  0x3f   :  { %190 = vmatmul.mubr.f32.gmra.mrb[6].mxu1 %v189_v55  ;;  %610 = vmatmul.mubr.f32.gmra.mrb[8].mxu0 %v198_v51  ;;  %v5612_v51 = vand.u32 4294901760, %v4674_v49  ;;  %v4695_v55 = vld [vmem:[#allocation3 + $0x50] sm:$0xff] }
  0x40   :  { %195 = vmatprep.mubr.f32.mxu1 %v4317_v0  ;;  %615 = vmatprep.mubr.f32.mxu0 %v4317_v0 }
  0x43   :  { %201 = vmatmul.mubr.f32.gmra.mrb[8].mxu1 %v200_v59  ;;  %619 = vmatmul.mubr.f32.gmra.mrb[10].mxu0 %v209_v54  ;;  %v4702_v59 = vld [vmem:[#allocation6 + $0x50] sm:$0xff] }
  0x44   :  { %206 = vmatprep.mubr.f32.mxu1 %v4317_v0  ;;  %624 = vmatprep.mubr.f32.mxu0 %v4317_v0 }
  0x47   :  { %212 = vmatmul.mubr.f32.gmra.mrb[10].mxu1 %v211_v63  ;;  %628 = vmatmul.mubr.f32.gmra.mrb[12].mxu0 %v220_v61  ;;  %v5606_v61 = vand.u32 4294901760, %v4702_v59 }
  0x48   :  { %217 = vmatprep.mubr.f32.mxu1 %v4317_v0  ;;  %633 = vmatprep.mubr.f32.mxu0 %v4317_v0 }
  0x4b   :  { %223 = vmatmul.mubr.f32.gmra.mrb[12].mxu1 %v222_v3  ;;  %637 = vmatmul.mubr.f32.gmra.mrb[14].mxu0 %v231_v2  ;;  %v4723_v2 = vld [vmem:[#allocation3 + $0x60] sm:$0xff]  ;;  %v4725_v3 = vld [vmem:[#allocation3 + $0x68] sm:$0xff] }
  0x4c   :  { %228 = vmatprep.mubr.f32.mxu1 %v4317_v0  ;;  %713 = vmatprep.mubr.f32.mxu0 %v4317_v0  ;;  %v5605_v4 = vand.u32 4294901760, %v4723_v2 }
  0x4f   :  { %234 = vmatmul.mubr.f32.gmra.mrb[14].mxu1 %v233_v13  ;;  %715 = vmatmul.mubr.f32.vlgmr.msra.gmra.mrb[0].mxu0 %v4397_v10  ;;  %v5604_v13 = vand.u32 4294901760, %v4725_v3 }
  0x50   :  { %314 = vmatprep.mubr.f32.mxu1 %v4317_v0  ;;  %720 = vmatprep.mubr.f32.mxu0 %v4317_v0 }
  0x51   :  { %773 = vmatpush1.msra.mxu0 %v4385_v5  ;;  %v4547_v5 = vld [vmem:[#allocation6 + $0x10] sm:$0xff] }
  0x52   :  { %3884 = vmatprep.subr.bf16.mxu0 %v4510_v21  ;;  %v5600_v24 = vand.u32 4294901760, %v4547_v5 }
  0x53   :  { %316 = vmatmul.mubr.f32.vlgmr.msra.gmra.mrb[0].mxu1 %v4397_v10  ;;  %722 = vmatmul.mubr.f32.gmra.mrb[2].mxu0 %v4408_v17 }
  0x54   :  { %376 = vmatpush1.msra.mxu1 %v4406_v15  ;;  %321 = vmatprep.mubr.f32.mxu1 %v4317_v0  ;;  %v4549_v15 = vld [vmem:[#allocation6 + $0x18] sm:$0xff] }
  0x55   :  { %727 = vmatprep.mubr.f32.mxu0 %v4317_v0  ;;  %3692 = vmatprep.subr.bf16.mxu1 %v4520_v22  ;;  %v5599_v27 = vand.u32 4294901760, %v4549_v15 }
  0x57   :  { %323 = vmatmul.mubr.f32.gmra.mrb[2].mxu1 %v4408_v17  ;;  %729 = vmatmul.mubr.f32.gmra.mrb[4].mxu0 %v4410_v18  ;;  %v4573_v33 = vpack.c.bf16 %v5599_v27, %v5600_v24  ;;  %v4743_v27 = vpack.c.bf16 %v5604_v13, %v5605_v4  ;;  %v4748_v24 = vsub.f32 %v4496_v8, %v942_v14  ;;  %v4763_v13 = vld [vmem:[#allocation3 + $0x78] sm:$0xff]  ;;  %v4768_v4 = vld [vmem:[#allocation6 + $0x70] sm:$0xff] }
  0x58   :  { %328 = vmatprep.mubr.f32.mxu1 %v4317_v0  ;;  %734 = vmatprep.mubr.f32.mxu0 %v4317_v0  ;;  %v5613_v14 = vand.u32 4294901760, %v4763_v13 }
  0x59   :  { %5726 = vst [vmem:[#allocation14_spill] sm:$0xff] %v4573_v33  ;;  %5736 = vst [vmem:[#allocation24_spill] sm:$0xff] %v4743_v27  ;;  %v5616_v16 = vand.u32 4294901760, %v4748_v24 }
  0x5a   :  { %5737 = vst [vmem:[#allocation25_spill] sm:$0xff] %v4748_v24 }
  0x5b   :  { %330 = vmatmul.mubr.f32.gmra.mrb[4].mxu1 %v4410_v18  ;;  %736 = vmatmul.mubr.f32.gmra.mrb[6].mxu0 %v4417_v20 }
  0x5c   :  { %335 = vmatprep.mubr.f32.mxu1 %v4317_v0  ;;  %741 = vmatprep.mubr.f32.mxu0 %v4317_v0 }
  0x5f   :  { %337 = vmatmul.mubr.f32.gmra.mrb[6].mxu1 %v4417_v20  ;;  %743 = vmatmul.mubr.f32.gmra.mrb[8].mxu0 %v4439_v35 }
  0x60   :  { %342 = vmatprep.mubr.f32.mxu1 %v4317_v0  ;;  %748 = vmatprep.mubr.f32.mxu0 %v4317_v0 }
  0x63   :  { %344 = vmatmul.mubr.f32.gmra.mrb[8].mxu1 %v4439_v35  ;;  %750 = vmatmul.mubr.f32.gmra.mrb[10].mxu0 %v4446_v41 }
  0x64   :  { %349 = vmatprep.mubr.f32.mxu1 %v4317_v0  ;;  %755 = vmatprep.mubr.f32.mxu0 %v4317_v0 }
  0x67   :  { %351 = vmatmul.mubr.f32.gmra.mrb[10].mxu1 %v4446_v41  ;;  %757 = vmatmul.mubr.f32.gmra.mrb[12].mxu0 %v4464_v52 }
  0x68   :  { %356 = vmatprep.mubr.f32.mxu1 %v4317_v0  ;;  %762 = vmatprep.mubr.f32.mxu0 %v4317_v0 }
  0x6b   :  { %358 = vmatmul.mubr.f32.gmra.mrb[12].mxu1 %v4464_v52  ;;  %764 = vmatmul.mubr.f32.gmra.mrb[14].mxu0 %v4474_v58 }
  0x6c   :  { %363 = vmatprep.mubr.f32.mxu1 %v4317_v0  ;;  %836 = vmatprep.mubr.f32.mxu0 %v4317_v0 }
  0x6f   :  { %365 = vmatmul.mubr.f32.gmra.mrb[14].mxu1 %v4474_v58  ;;  %838 = vmatmul.mubr.f32.vlgmr.msra.gmra.mrb[0].mxu0 %v4397_v10  ;;  %v5598_v10 = vand.u32 4294901760, %v4579_v38 }
  0x70   :  { %439 = vmatprep.mubr.f32.mxu1 %v4317_v0  ;;  %843 = vmatprep.mubr.f32.mxu0 %v4317_v0 }
  0x71   :  { %3886 = vmatpush3.bf16.msra.mxu0 %v4510_v21  ;;  %v4612_v44 = vpack.c.bf16 %v5597_v42, %v5598_v10  ;;  %v5608_v42 = vand.u32 4294901760, %v4730_v37  ;;  %v5607_v10 = vand.u32 4294901760, %v4732_v36 }
  0x72   :  { %3888 = vmatprep.subr.bf16.mxu0 %v4573_v33 }
  0x73   :  { %442 = vmatmul.mubr.f32.vlgmr.msra.gmra.mrb[0].mxu1 %v4414_v19  ;;  %845 = vmatmul.mubr.f32.gmra.mrb[2].mxu0 %v4408_v17  ;;  %5729 = vst [vmem:[#allocation17_spill] sm:$0xff] %v4612_v44  ;;  %v4643_v17 = vld [vmem:[#allocation3 + $0x30] sm:$0xff]  ;;  %v4759_v31 = vpack.c.bf16 %v5607_v10, %v5608_v42  ;;  %v5618_v10 = vand.u32 4294901760, %v4768_v4  ;;  %v5617_v42 = vand.u32 4294901760, %v4770_v9 }
  0x74   :  { %447 = vmatprep.mubr.f32.mxu1 %v4317_v0  ;;  %850 = vmatprep.mubr.f32.mxu0 %v4317_v0  ;;  %v960_v19 = vand.u32 4294901760, %v4643_v17 }
  0x75   :  { %3694 = vmatpush3.bf16.msra.mxu1 %v4520_v22  ;;  %3890 = vmatpush3.bf16.msra.mxu0 %v4573_v33  ;;  %5739 = vst [vmem:[#allocation27_spill] sm:$0xff] %v4759_v31 }
  0x76   :  { %3696 = vmatprep.subr.bf16.mxu1 %v4590_v40  ;;  %3892 = vmatprep.subr.bf16.mxu0 %v4599_v43 }
  0x77   :  { %450 = vmatmul.mubr.f32.gmra.mrb[2].mxu1 %v4425_v25  ;;  %852 = vmatmul.mubr.f32.gmra.mrb[4].mxu0 %v4410_v18  ;;  %v4645_v18 = vld [vmem:[#allocation3 + $0x38] sm:$0xff]  ;;  %v4649_v25 = vld [vmem:[#allocation6 + $0x30] sm:$0xff] }
  0x78   :  { %455 = vmatprep.mubr.f32.mxu1 %v4317_v0  ;;  %857 = vmatprep.mubr.f32.mxu0 %v4317_v0 }
  0x79   :  { %3698 = vmatpush3.bf16.msra.mxu1 %v4590_v40  ;;  %3894 = vmatpush3.bf16.msra.mxu0 %v4599_v43 }
  0x7a   :  { %3700 = vmatprep.subr.bf16.mxu1 %v4612_v44 }
  0x7b   :  { %458 = vmatmul.mubr.f32.gmra.mrb[4].mxu1 %v4428_v26  ;;  %859 = vmatmul.mubr.f32.gmra.mrb[6].mxu0 %v4417_v20  ;;  %v963_v20 = vand.u32 4294901760, %v4645_v18  ;;  %v4651_v26 = vld [vmem:[#allocation6 + $0x38] sm:$0xff] }
  0x7c   :  { %463 = vmatprep.mubr.f32.mxu1 %v4317_v0  ;;  %864 = vmatprep.mubr.f32.mxu0 %v4317_v0 }
  0x7d   :  { %3702 = vmatpush3.bf16.msra.mxu1 %v4612_v44 }
  0x7f   :  { %466 = vmatmul.mubr.f32.gmra.mrb[6].mxu1 %v4437_v34  ;;  %866 = vmatmul.mubr.f32.gmra.mrb[8].mxu0 %v4439_v35  ;;  %v1918_v34 = vand.u32 4294901760, %v4649_v25  ;;  %v1921_v35 = vand.u32 4294901760, %v4651_v26 }
  0x80   :  { %471 = vmatprep.mubr.f32.mxu1 %v4317_v0  ;;  %871 = vmatprep.mubr.f32.mxu0 %v4317_v0 }
  0x83   :  { %474 = vmatmul.mubr.f32.gmra.mrb[8].mxu1 %v4451_v45  ;;  %873 = vmatmul.mubr.f32.gmra.mrb[10].mxu0 %v4446_v41  ;;  %v4665_v41 = vpack.c.bf16 %v1921_v35, %v1918_v34  ;;  %v4667_v45 = vld [vmem:[#allocation3 + $0x40] sm:$0xff] }
  0x84   :  { %479 = vmatprep.mubr.f32.mxu1 %v4317_v0  ;;  %878 = vmatprep.mubr.f32.mxu0 %v4317_v0  ;;  %v966_v47 = vand.u32 4294901760, %v4667_v45 }
  0x85   :  { %5731 = vst [vmem:[#allocation19_spill] sm:$0xff] %v4665_v41  ;;  %3896 = vmatprep.subr.bf16.mxu0 %v4665_v41 }
  0x86   :  { %3898 = vmatpush3.bf16.msra.mxu0 %v4665_v41 }
  0x87   :  { %482 = vmatmul.mubr.f32.gmra.mrb[10].mxu1 %v4460_v48  ;;  %880 = vmatmul.mubr.f32.gmra.mrb[12].mxu0 %v4464_v52  ;;  %v5619_v48 = vand.u32 4294901760, %v4669_v46  ;;  %v5611_v52 = vand.u32 4294901760, %v4676_v50 }
  0x88   :  { %487 = vmatprep.mubr.f32.mxu1 %v4317_v0  ;;  %885 = vmatprep.mubr.f32.mxu0 %v4317_v0 }
  0x89   :  { %v4687_v53 = vpack.c.bf16 %v5619_v48, %v966_v47  ;;  %v4693_v54 = vpack.c.bf16 %v5611_v52, %v5612_v51  ;;  %v1106_v51 = vsub.f32 %v4748_v24, %v5616_v16 }
  0x8b   :  { %490 = vmatmul.mubr.f32.gmra.mrb[12].mxu1 %v4472_v57  ;;  %887 = vmatmul.mubr.f32.gmra.mrb[14].mxu0 %v4474_v58  ;;  %5732 = vst [vmem:[#allocation20_spill] sm:$0xff] %v4687_v53  ;;  %5733 = vst [vmem:[#allocation21_spill] sm:$0xff] %v4693_v54  ;;  %v5610_v57 = vand.u32 4294901760, %v4695_v55  ;;  %v5609_v58 = vand.u32 4294901760, %v4697_v56 }
  0x8c   :  { %495 = vmatprep.mubr.f32.mxu1 %v4317_v0  ;;  %v4659_v0 = vpack.c.bf16 %v963_v20, %v960_v19  ;;  %3900 = vmatprep.subr.bf16.mxu0 %v4693_v54 }
  0x8d   :  { %3902 = vmatpush3.bf16.msra.mxu0 %v4693_v54  ;;  %v4715_v63 = vpack.c.bf16 %v5609_v58, %v5610_v57  ;;  %v4781_v58 = vsub.f32 %v4490_v6, %v1900_v11  ;;  %v4786_v57 = vsub.f32 %v4492_v7, %v1903_v12  ;;  %v4805_v7 = vpack.c.bf16 %v5617_v42, %v5618_v10 }
  0x8e   :  { %5730 = vst [vmem:[#allocation18_spill] sm:$0xff] %v4659_v0  ;;  %3704 = vmatprep.subr.bf16.mxu1 %v4659_v0 }
  0x8f   :  { %498 = vmatmul.mubr.f32.gmra.mrb[14].mxu1 %v4481_v62  ;;  %v5603_v62 = vand.u32 4294901760, %v4704_v60  ;;  %5734 = vst [vmem:[#allocation22_spill] sm:$0xff] %v4715_v63  ;;  %5740 = vst [vmem:[#allocation28_spill] sm:$0xff] %v4781_v58  ;;  %v5624_v11 = vand.u32 4294901760, %v4781_v58  ;;  %v5620_v12 = vand.u32 4294901760, %v4786_v57 }
  0x90   :  { %3706 = vmatpush3.bf16.msra.mxu1 %v4659_v0  ;;  %5741 = vst [vmem:[#allocation29_spill] sm:$0xff] %v4786_v57  ;;  %5743 = vst [vmem:[#allocation31_spill] sm:$0xff] %v4805_v7 }
  0x91   :  { %3708 = vmatprep.subr.bf16.mxu1 %v4687_v53  ;;  %v4721_v1 = vpack.c.bf16 %v5603_v62, %v5606_v61  ;;  %v4761_v62 = vld [vmem:[#allocation3 + $0x70] sm:$0xff]  ;;  %v5615_v61 = vand.u32 4294901760, %v4753_v32  ;;  %v2071_v16 = vsub.f32 %v4786_v57, %v5620_v12  ;;  %v4833_v12 = vsub.f32 %v4645_v18, %v963_v20 }
  0x92   :  { %v5614_v8 = vand.u32 4294901760, %v4761_v62  ;;  %v4857_v20 = vsub.f32 %v4667_v45, %v966_v47 }
  0x93   :  { %5735 = vst [vmem:[#allocation23_spill] sm:$0xff] %v4721_v1  ;;  %3904 = vmatprep.subr.bf16.mxu0 %v4721_v1  ;;  %v1113_v6 = vsub.f32 %v4753_v32, %v5615_v61  ;;  %v2064_v61 = vsub.f32 %v4781_v58, %v5624_v11  ;;  %v2072_v48 = vand.u32 4294901760, %v2071_v16  ;;  %5745 = vst [vmem:[#allocation33_spill] sm:$0xff] %v4833_v12 }
  0x94   :  { %3710 = vmatpush3.bf16.msra.mxu1 %v4687_v53  ;;  %3906 = vmatpush3.bf16.msra.mxu0 %v4721_v1  ;;  %v4793_v52 = vpack.c.bf16 %v5613_v14, %v5614_v8  ;;  %v1107_v14 = vand.u32 4294901760, %v1106_v51  ;;  %5748 = vst [vmem:[#allocation36_spill] sm:$0xff] %v4857_v20 }
  0x95   :  { %3712 = vmatprep.subr.bf16.mxu1 %v4715_v63  ;;  %3908 = vmatprep.subr.bf16.mxu0 %v4759_v31  ;;  %v1114_v8 = vand.u32 4294901760, %v1113_v6  ;;  %v2065_v10 = vand.u32 4294901760, %v2064_v61  ;;  %v4828_v6 = vsub.f32 %v4643_v17, %v960_v19  ;;  %v5621_v61 = vand.u32 4294901760, %v4833_v12 }
  0x96   :  { %5742 = vst [vmem:[#allocation30_spill] sm:$0xff] %v4793_v52  ;;  %v4848_v17 = vsub.f32 %v4651_v26, %v1921_v35 }
  0x97   :  { %v4819_v42 = vpack.c.bf16 %v1114_v8, %v1107_v14  ;;  %v4822_v51 = vpack.c.bf16 %v2072_v48, %v2065_v10  ;;  %5744 = vst [vmem:[#allocation32_spill] sm:$0xff] %v4828_v6  ;;  %v5622_v8 = vand.u32 4294901760, %v4828_v6  ;;  %v4840_v10 = vsub.f32 %v4649_v25, %v1918_v34 }
  0x98   :  { %3714 = vmatpush3.bf16.msra.mxu1 %v4715_v63  ;;  %3910 = vmatpush3.bf16.msra.mxu0 %v4759_v31  ;;  %5747 = vst [vmem:[#allocation35_spill] sm:$0xff] %v4848_v17  ;;  %v1155_v18 = vsub.f32 %v4833_v12, %v5621_v61  ;;  %v5625_v34 = vand.u32 4294901760, %v4848_v17  ;;  %v5749_v14 = vand.u32 4294901760, %v4669_v46  ;;  %v5631_v61 = vand.u32 4294901760, %v4857_v20 }
  0x99   :  { %3716 = vmatprep.subr.bf16.mxu1 %v4743_v27  ;;  %3912 = vmatprep.subr.bf16.mxu0 %v4805_v7  ;;  %5746 = vst [vmem:[#allocation34_spill] sm:$0xff] %v4840_v10  ;;  %v1148_v48 = vsub.f32 %v4828_v6, %v5622_v8  ;;  %v5623_v19 = vand.u32 4294901760, %v4840_v10  ;;  %v5751_v8 = vand.u32 4294901760, %v4674_v49 }
  0x9a   :  { %v4863_v16 = vsub.f32 %v4669_v46, %v5749_v14  ;;  %v1156_v26 = vand.u32 4294901760, %v1155_v18  ;;  %v2113_v47 = vsub.f32 %v4848_v17, %v5625_v34  ;;  %v5753_v46 = vand.u32 4294901760, %v4676_v50 }
  0x9b   :  { %v1149_v25 = vand.u32 4294901760, %v1148_v48  ;;  %v2106_v35 = vsub.f32 %v4840_v10, %v5623_v19  ;;  %v4872_v45 = vsub.f32 %v4674_v49, %v5751_v8  ;;  %v1162_v11 = vsub.f32 %v4857_v20, %v5631_v61 }
  0x9c   :  { %3718 = vmatpush3.bf16.msra.mxu1 %v4743_v27  ;;  %3914 = vmatpush3.bf16.msra.mxu0 %v4805_v7  ;;  %5750 = vst [vmem:[#allocation37_spill] sm:$0xff] %v4863_v16  ;;  %v5630_v48 = vand.u32 4294901760, %v4863_v16  ;;  %v4881_v18 = vsub.f32 %v4676_v50, %v5753_v46  ;;  %v2114_v8 = vand.u32 4294901760, %v2113_v47  ;;  %v5759_v46 = vand.u32 4294901760, %v4702_v59 }
  0x9d   :  { %3720 = vmatprep.subr.bf16.mxu1 %v4793_v52  ;;  %3916 = vmatprep.subr.bf16.mxu0 %v4822_v51  ;;  %5752 = vst [vmem:[#allocation38_spill] sm:$0xff] %v4872_v45  ;;  %v4883_v14 = vpack.c.bf16 %v1156_v26, %v1149_v25  ;;  %v2107_v19 = vand.u32 4294901760, %v2106_v35  ;;  %v5632_v49 = vand.u32 4294901760, %v4872_v45  ;;  %v1163_v25 = vand.u32 4294901760, %v1162_v11 }
  0x9e   :  { %5754 = vst [vmem:[#allocation39_spill] sm:$0xff] %v4881_v18  ;;  %v1169_v34 = vsub.f32 %v4863_v16, %v5630_v48  ;;  %v5757_v35 = vand.u32 4294901760, %v4697_v56  ;;  %v4909_v48 = vsub.f32 %v4702_v59, %v5759_v46 }
  0x9f   :  { %v2120_v26 = vsub.f32 %v4872_v45, %v5632_v49  ;;  %v4911_v61 = vpack.c.bf16 %v2114_v8, %v2107_v19  ;;  %v5764_v8 = vand.u32 4294901760, %v4723_v2 }
  0xa0   :  { %3722 = vmatpush3.bf16.msra.mxu1 %v4793_v52  ;;  %v5755_v52 = vand.u32 4294901760, %v4695_v55  ;;  %v4904_v47 = vsub.f32 %v4697_v56, %v5757_v35  ;;  %5760 = vst [vmem:[#allocation42_spill] sm:$0xff] %v4909_v48  ;;  %v1170_v7 = vand.u32 4294901760, %v1169_v34  ;;  %v5641_v56 = vand.u32 4294901760, %v4909_v48 }
  0xa1   :  { %3724 = vmatprep.subr.bf16.mxu1 %v4819_v42  ;;  %v2121_v49 = vand.u32 4294901760, %v2120_v26  ;;  %v5762_v35 = vand.u32 4294901760, %v4704_v60  ;;  %v4932_v26 = vsub.f32 %v4723_v2, %v5764_v8  ;;  %v5768_v8 = vand.u32 4294901760, %v4730_v37 }
  0xa2   :  { %v4896_v50 = vsub.f32 %v4695_v55, %v5755_v52  ;;  %5758 = vst [vmem:[#allocation41_spill] sm:$0xff] %v4904_v47  ;;  %v5761_v52 = vand.u32 4294901760, %v4881_v18  ;;  %v5637_v31 = vand.u32 4294901760, %v4904_v47  ;;  %v4924_v59 = vpack.c.bf16 %v1170_v7, %v1163_v25 }
  0xa3   :  { %v4922_v27 = vsub.f32 %v4704_v60, %v5762_v35  ;;  %5765 = vst [vmem:[#allocation44_spill] sm:$0xff] %v4932_v26  ;;  %v2134_v60 = vsub.f32 %v4909_v48, %v5641_v56  ;;  %v5766_v25 = vand.u32 4294901760, %v4725_v3  ;;  %v5644_v2 = vand.u32 4294901760, %v4932_v26 }
  0xa4   :  { %5756 = vst [vmem:[#allocation40_spill] sm:$0xff] %v4896_v50  ;;  %v2127_v55 = vsub.f32 %v4881_v18, %v5761_v52  ;;  %v5638_v11 = vand.u32 4294901760, %v4896_v50  ;;  %v1183_v46 = vsub.f32 %v4904_v47, %v5637_v31  ;;  %v4952_v31 = vsub.f32 %v4730_v37, %v5768_v8 }
  0xa5   :  { %5763 = vst [vmem:[#allocation43_spill] sm:$0xff] %v4922_v27  ;;  %v5645_v7 = vand.u32 4294901760, %v4922_v27  ;;  %v4944_v52 = vsub.f32 %v4725_v3, %v5766_v25  ;;  %v2135_v1 = vand.u32 4294901760, %v2134_v60  ;;  %v1190_v3 = vsub.f32 %v4932_v26, %v5644_v2 }
  0xa6   :  { %v2128_v19 = vand.u32 4294901760, %v2127_v55  ;;  %v1176_v34 = vsub.f32 %v4896_v50, %v5638_v11  ;;  %5769 = vst [vmem:[#allocation46_spill] sm:$0xff] %v4952_v31  ;;  %v1184_v11 = vand.u32 4294901760, %v1183_v46  ;;  %v5772_v37 = vand.u32 4294901760, %v4761_v62 }
  0xa7   :  { %5767 = vst [vmem:[#allocation45_spill] sm:$0xff] %v4944_v52  ;;  %v2141_v56 = vsub.f32 %v4922_v27, %v5645_v7  ;;  %v5646_v63 = vand.u32 4294901760, %v4944_v52  ;;  %v5774_v2 = vand.u32 4294901760, %v4763_v13 }
  0xa8   :  { %v4946_v55 = vpack.c.bf16 %v2128_v19, %v2121_v49  ;;  %v1177_v35 = vand.u32 4294901760, %v1176_v34  ;;  %v5770_v19 = vand.u32 4294901760, %v4732_v36  ;;  %v4970_v46 = vsub.f32 %v4761_v62, %v5772_v37 }
  0xa9   :  { %v2142_v25 = vand.u32 4294901760, %v2141_v56  ;;  %v1197_v8 = vsub.f32 %v4944_v52, %v5646_v63  ;;  %v4980_v7 = vsub.f32 %v4763_v13, %v5774_v2  ;;  %v1191_v49 = vand.u32 4294901760, %v1190_v3 }
  0xaa   :  { %v4965_v34 = vsub.f32 %v4732_v36, %v5770_v19  ;;  %5773 = vst [vmem:[#allocation48_spill] sm:$0xff] %v4970_v46  ;;  %v4972_v60 = vpack.c.bf16 %v1184_v11, %v1177_v35  ;;  %v5776_v36 = vand.u32 4294901760, %v4952_v31  ;;  %v5652_v11 = vand.u32 4294901760, %v4970_v46 }
  0xab   :  { %5775 = vst [vmem:[#allocation49_spill] sm:$0xff] %v4980_v7  ;;  %v4987_v35 = vpack.c.bf16 %v2142_v25, %v2135_v1  ;;  %v1198_v56 = vand.u32 4294901760, %v1197_v8  ;;  %v5657_v37 = vand.u32 4294901760, %v4980_v7  ;;  %v5777_v63 = vand.u32 4294901760, %v4768_v4 }
  0xac   :  { %5771 = vst [vmem:[#allocation47_spill] sm:$0xff] %v4965_v34  ;;  %v2148_v19 = vsub.f32 %v4952_v31, %v5776_v36  ;;  %v5649_v62 = vand.u32 4294901760, %v4965_v34  ;;  %v1204_v3 = vsub.f32 %v4970_v46, %v5652_v11  ;;  %v5779_v1 = vand.u32 4294901760, %v4770_v9 }
  0xad   :  { %v4993_v54 = vsub.f32 %v4768_v4, %v5777_v63  ;;  %v5006_v8 = vpack.c.bf16 %v1198_v56, %v1191_v49  ;;  %v1211_v63 = vsub.f32 %v4980_v7, %v5657_v37  ;;  %v5787_v37 = vand.u32 4294901760, %v4553_v23 }
  0xae   :  { %v2149_v13 = vand.u32 4294901760, %v2148_v19  ;;  %v2155_v2 = vsub.f32 %v4965_v34, %v5649_v62  ;;  %v5004_v25 = vsub.f32 %v4770_v9, %v5779_v1  ;;  %v1205_v19 = vand.u32 4294901760, %v1204_v3 }
  0xaf   :  { %5778 = vst [vmem:[#allocation50_spill] sm:$0xff] %v4993_v54  ;;  %v5656_v4 = vand.u32 4294901760, %v4993_v54  ;;  %v1212_v53 = vand.u32 4294901760, %v1211_v63  ;;  %v5031_v63 = vpack.c.bf16 %v4786_v57, %v4781_v58 }
  0xb0   :  { %5780 = vst [vmem:[#allocation51_spill] sm:$0xff] %v5004_v25  ;;  %v2156_v36 = vand.u32 4294901760, %v2155_v2  ;;  %v5655_v62 = vand.u32 4294901760, %v5004_v25  ;;  %v5025_v2 = vpack.c.bf16 %v4753_v32, %v4748_v24 }
  0xb1   :  { %v2162_v11 = vsub.f32 %v4993_v54, %v5656_v4  ;;  %v5021_v49 = vpack.c.bf16 %v1212_v53, %v1205_v19  ;;  %v5039_v53 = vpack.c.bf16 %v4848_v17, %v4840_v10  ;;  %v5051_v19 = vpack.c.bf16 %v4904_v47, %v4896_v50 }
  0xb2   :  { %v5016_v41 = vpack.c.bf16 %v2156_v36, %v2149_v13  ;;  %v2169_v9 = vsub.f32 %v5004_v25, %v5655_v62  ;;  %v5035_v13 = vpack.c.bf16 %v4833_v12, %v4828_v6  ;;  %v5047_v36 = vpack.c.bf16 %v4881_v18, %v4872_v45 }
  0xb3   :  { %v2163_v56 = vand.u32 4294901760, %v2162_v11  ;;  %v5043_v11 = vpack.c.bf16 %v4863_v16, %v4857_v20  ;;  %5781 = vst [vmem:[#allocation52_spill] sm:$0xff] %v5051_v19  ;;  %v5067_v62 = vpack.c.bf16 %v4980_v7, %v4970_v46  ;;  %v5071_v4 = vpack.c.bf16 %v5004_v25, %v4993_v54 }
  0xb4   :  { %v2170_v1 = vand.u32 4294901760, %v2169_v9  ;;  %v5055_v9 = vpack.c.bf16 %v4922_v27, %v4909_v48  ;;  %v5076_v27 = vsub.f32 %v4553_v23, %v5787_v37  ;;  %v5790_v7 = vand.u32 4294901760, %v4549_v15 }
  0xb5   :  { %5785 = vst [vmem:[#allocation56_spill] sm:$0xff] %v5067_v62  ;;  %5786 = vst [vmem:[#allocation57_spill] sm:$0xff] %v5071_v4 }
  0xb6   :  { %v5027_v3 = vpack.c.bf16 %v2170_v1, %v2163_v56  ;;  %5782 = vst [vmem:[#allocation53_spill] sm:$0xff] %v5055_v9  ;;  %v5059_v56 = vpack.c.bf16 %v4944_v52, %v4932_v26  ;;  %v5063_v1 = vpack.c.bf16 %v4965_v34, %v4952_v31  ;;  %v5788_v52 = vand.u32 4294901760, %v4559_v28 }
  0xb7   :  { %v5789_v34 = vand.u32 4294901760, %v4547_v5  ;;  %v5091_v25 = vsub.f32 %v4549_v15, %v5790_v7  ;;  %v5672_v54 = vand.u32 4294901760, %v5076_v27 }
  0xb8   :  { %5783 = vst [vmem:[#allocation54_spill] sm:$0xff] %v5059_v56  ;;  %5784 = vst [vmem:[#allocation55_spill] sm:$0xff] %v5063_v1  ;;  %v5081_v26 = vsub.f32 %v4559_v28, %v5788_v52  ;;  %v5792_v28 = vand.u32 4294901760, %v4581_v39 }
  0xb9   :  { %v5086_v31 = vsub.f32 %v4547_v5, %v5789_v34  ;;  %v1120_v5 = vsub.f32 %v5076_v27, %v5672_v54  ;;  %v5791_v34 = vand.u32 4294901760, %v4579_v38  ;;  %v5794_v20 = vand.u32 4294901760, %v5091_v25 }
  0xba   :  { %v5674_v23 = vand.u32 4294901760, %v5081_v26  ;;  %v5111_v45 = vsub.f32 %v4581_v39, %v5792_v28 }
  0xbb   :  { %v5106_v47 = vsub.f32 %v4579_v38, %v5791_v34  ;;  %v5793_v16 = vand.u32 4294901760, %v5086_v31  ;;  %v2085_v17 = vsub.f32 %v5091_v25, %v5794_v20  ;;  %v1121_v38 = vand.u32 4294901760, %v1120_v5 }
  0xbc   :  { %v1127_v52 = vsub.f32 %v5081_v26, %v5674_v23  ;;  %v5799_v0 = vand.u32 4294901760, %v5111_v45 }
  0xbd   :  { %v2078_v23 = vsub.f32 %v5086_v31, %v5793_v16  ;;  %v5796_v16 = vand.u32 4294901760, %v4563_v30  ;;  %v2086_v32 = vand.u32 4294901760, %v2085_v17 }
  0xbf   :  { %v5132_v12 = vsub.f32 %v4563_v30, %v5796_v16  ;;  %v2079_v58 = vand.u32 4294901760, %v2078_v23 }
  0xc1   :  { %v5169_v44 = vpack.c.bf16 %v2086_v32, %v2079_v58 }
 0x142   :  { %v839_v37 = vpop.f32.mrb[0].mxu0 }
 0x143   :  { %v841_v46 = vpop.f32.mrb[1].mxu0 }
 0x146   :  { %v443_v15 = vpop.f32.mrb[0].mxu1  ;;  %v846_v7 = vpop.f32.mrb[2].mxu0 }
 0x147   :  { %v4075_v50 = vadd.f32 %v839_v37, %v443_v15  ;;  %v445_v18 = vpop.f32.mrb[1].mxu1  ;;  %v848_v48 = vpop.f32.mrb[3].mxu0  ;;  %v1128_v37 = vand.u32 4294901760, %v1127_v52  ;;  %v5795_v15 = vand.u32 4294901760, %v4561_v29 }
 0x148   :  { %v4076_v54 = vadd.f32 %v841_v46, %v445_v18 }
 0x149   :  { %v5119_v10 = vand.u32 4294901760, %v4075_v50  ;;  %v5124_v34 = vsub.f32 %v4561_v29, %v5795_v15  ;;  %v5144_v30 = vpack.c.bf16 %v1128_v37, %v1121_v38  ;;  %v1141_v29 = vsub.f32 %v5111_v45, %v5799_v0 }
 0x14a   :  { %v5126_v39 = vand.u32 4294901760, %v4076_v54  ;;  %v451_v18 = vpop.f32.mrb[2].mxu1  ;;  %v853_v46 = vpop.f32.mrb[4].mxu0 }
 0x14b   :  { %v5135_v20 = vsub.f32 %v4075_v50, %v5119_v10  ;;  %v4077_v5 = vadd.f32 %v846_v7, %v451_v18  ;;  %v453_v52 = vpop.f32.mrb[3].mxu1  ;;  %v855_v6 = vpop.f32.mrb[5].mxu0  ;;  %v1142_v56 = vand.u32 4294901760, %v1141_v29 }
 0x14c   :  { %v5139_v15 = vsub.f32 %v4076_v54, %v5126_v39  ;;  %v4078_v57 = vadd.f32 %v848_v48, %v453_v52  ;;  %v5797_v54 = vand.u32 4294901760, %v5106_v47 }
 0x14d   :  { %v5141_v28 = vand.u32 4294901760, %v4077_v5  ;;  %v5692_v24 = vand.u32 4294901760, %v5135_v20 }
 0x14e   :  { %v5147_v16 = vand.u32 4294901760, %v4078_v57  ;;  %v459_v7 = vpop.f32.mrb[4].mxu1  ;;  %v860_v18 = vpop.f32.mrb[6].mxu0  ;;  %v1134_v48 = vsub.f32 %v5106_v47, %v5797_v54  ;;  %v5800_v17 = vand.u32 4294901760, %v5139_v15 }
 0x14f   :  { %v5155_v23 = vsub.f32 %v4077_v5, %v5141_v28  ;;  %v4079_v52 = vadd.f32 %v853_v46, %v459_v7  ;;  %v461_v38 = vpop.f32.mrb[5].mxu1  ;;  %v862_v37 = vpop.f32.mrb[7].mxu0  ;;  %v1025_v50 = vsub.f32 %v5135_v20, %v5692_v24  ;;  %v5801_v24 = vand.u32 4294901760, %v5124_v34 }
 0x150   :  { %v5164_v43 = vsub.f32 %v4078_v57, %v5147_v16  ;;  %v4080_v54 = vadd.f32 %v855_v6, %v461_v38  ;;  %v1983_v5 = vsub.f32 %v5139_v15, %v5800_v17  ;;  %v5802_v17 = vand.u32 4294901760, %v5132_v12 }
 0x151   :  { %5798 = vst [vmem:[#allocation58_spill] sm:$0xff] %v5155_v23  ;;  %v5704_v46 = vand.u32 4294901760, %v5155_v23  ;;  %v5172_v7 = vand.u32 4294901760, %v4079_v52  ;;  %v1026_v33 = vand.u32 4294901760, %v1025_v50  ;;  %v2092_v40 = vsub.f32 %v5124_v34, %v5801_v24 }
 0x152   :  { %v5178_v57 = vand.u32 4294901760, %v4080_v54  ;;  %v467_v6 = vpop.f32.mrb[6].mxu1  ;;  %v867_v38 = vpop.f32.mrb[8].mxu0  ;;  %v1984_v21 = vand.u32 4294901760, %v1983_v5  ;;  %v2099_v32 = vsub.f32 %v5132_v12, %v5802_v17  ;;  %v1135_v0 = vand.u32 4294901760, %v1134_v48 }
 0x153   :  { %v1035_v58 = vsub.f32 %v5155_v23, %v5704_v46  ;;  %v5187_v50 = vsub.f32 %v4079_v52, %v5172_v7  ;;  %v4081_v22 = vadd.f32 %v860_v18, %v467_v6  ;;  %v469_v24 = vpop.f32.mrb[7].mxu1  ;;  %v869_v4 = vpop.f32.mrb[9].mxu0  ;;  %3195 = vmatprep.mubr.f32.mxu1 %v1026_v33  ;;  %v5803_v62 = vand.u32 4294901760, %v5164_v43 }
 0x154   :  { %v5193_v1 = vsub.f32 %v4080_v54, %v5178_v57  ;;  %v4082_v17 = vadd.f32 %v862_v37, %v469_v24  ;;  %3459 = vmatprep.mubr.f32.mxu0 %v1984_v21  ;;  %v2093_v18 = vand.u32 4294901760, %v2092_v40 }
 0x155   :  { %v1993_v5 = vsub.f32 %v5164_v43, %v5803_v62  ;;  %v1036_v9 = vand.u32 4294901760, %v1035_v58  ;;  %v5195_v46 = vand.u32 4294901760, %v4081_v22  ;;  %v5709_v52 = vand.u32 4294901760, %v5187_v50 }
 0x156   :  { %5804 = vst [vmem:[#allocation59_spill] sm:$0xff] %v5193_v1  ;;  %v5198_v23 = vand.u32 4294901760, %v4082_v17  ;;  %v475_v33 = vpop.f32.mrb[8].mxu1  ;;  %v874_v48 = vpop.f32.mrb[10].mxu0  ;;  %v5708_v19 = vand.u32 4294901760, %v5193_v1  ;;  %v2100_v62 = vand.u32 4294901760, %v2099_v32 }
 0x157   :  { %v1994_v6 = vand.u32 4294901760, %v1993_v5  ;;  %v5202_v54 = vsub.f32 %v4081_v22, %v5195_v46  ;;  %v4083_v37 = vadd.f32 %v867_v38, %v475_v33  ;;  %v477_v21 = vpop.f32.mrb[9].mxu1  ;;  %v876_v29 = vpop.f32.mrb[11].mxu0  ;;  %3196 = vmatmul.mubr.f32.vlgmr.msra.gmra.mrb[16].mxu1 %v1036_v9  ;;  %v1045_v58 = vsub.f32 %v5187_v50, %v5709_v52 }
 0x158   :  { %v5208_v40 = vsub.f32 %v4082_v17, %v5198_v23  ;;  %v4084_v24 = vadd.f32 %v869_v4, %v477_v21  ;;  %3726 = vmatpush3.bf16.msra.mxu1 %v4819_v42  ;;  %v2003_v22 = vsub.f32 %v5193_v1, %v5708_v19  ;;  %v3731_v38 = vpack.c.bf16 %v1142_v56, %v1135_v0 }
 0x159   :  { %3460 = vmatmul.mubr.f32.vlgmr.msra.gmra.mrb[16].mxu0 %v1994_v6  ;;  %v5214_v32 = vand.u32 4294901760, %v4083_v37  ;;  %3728 = vmatprep.subr.bf16.mxu1 %v5144_v30  ;;  %v1046_v9 = vand.u32 4294901760, %v1045_v58  ;;  %v5713_v5 = vand.u32 4294901760, %v5202_v54  ;;  %v3923_v6 = vpack.c.bf16 %v2100_v62, %v2093_v18 }
 0x15a   :  { %3918 = vmatpush3.bf16.msra.mxu0 %v4822_v51  ;;  %v5219_v17 = vand.u32 4294901760, %v4084_v24  ;;  %v483_v4 = vpop.f32.mrb[10].mxu1  ;;  %v881_v33 = vpop.f32.mrb[12].mxu0  ;;  %v2004_v42 = vand.u32 4294901760, %v2003_v22  ;;  %v5712_v21 = vand.u32 4294901760, %v5208_v40 }
 0x15b   :  { %3920 = vmatprep.subr.bf16.mxu0 %v5169_v44  ;;  %v5224_v19 = vsub.f32 %v4083_v37, %v5214_v32  ;;  %v4085_v51 = vadd.f32 %v874_v48, %v483_v4  ;;  %v485_v52 = vpop.f32.mrb[11].mxu1  ;;  %v883_v1 = vpop.f32.mrb[13].mxu0  ;;  %3198 = vmatprep.mubr.f32.mxu1 %v1046_v9  ;;  %v1055_v56 = vsub.f32 %v5202_v54, %v5713_v5 }
 0x15c   :  { %v5230_v0 = vsub.f32 %v4084_v24, %v5219_v17  ;;  %v4086_v58 = vadd.f32 %v876_v29, %v485_v52  ;;  %3730 = vmatpush3.bf16.msra.mxu1 %v5144_v30  ;;  %3462 = vmatprep.mubr.f32.mxu0 %v2004_v42  ;;  %v2013_v18 = vsub.f32 %v5208_v40, %v5712_v21 }
 0x15d   :  { %v5236_v62 = vand.u32 4294901760, %v4085_v51  ;;  %3732 = vmatprep.subr.bf16.mxu1 %v3731_v38  ;;  %v1056_v48 = vand.u32 4294901760, %v1055_v56  ;;  %v5714_v37 = vand.u32 4294901760, %v5224_v19 }
 0x15e   :  { %3922 = vmatpush3.bf16.msra.mxu0 %v5169_v44  ;;  %v5240_v22 = vand.u32 4294901760, %v4086_v58  ;;  %v491_v24 = vpop.f32.mrb[12].mxu1  ;;  %v888_v9 = vpop.f32.mrb[14].mxu0  ;;  %v2014_v52 = vand.u32 4294901760, %v2013_v18  ;;  %v5715_v30 = vand.u32 4294901760, %v5230_v0 }
 0x15f   :  { %3924 = vmatprep.subr.bf16.mxu0 %v3923_v6  ;;  %v5244_v29 = vsub.f32 %v4085_v51, %v5236_v62  ;;  %v4087_v4 = vadd.f32 %v881_v33, %v491_v24  ;;  %v493_v42 = vpop.f32.mrb[13].mxu1  ;;  %v890_v21 = vpop.f32.mrb[15].mxu0  ;;  %3199 = vmatmul.mubr.f32.gmra.mrb[18].mxu1 %v1056_v48  ;;  %v1065_v44 = vsub.f32 %v5224_v19, %v5714_v37 }
 0x160   :  { %v5250_v56 = vsub.f32 %v4086_v58, %v5240_v22  ;;  %v4088_v5 = vadd.f32 %v883_v1, %v493_v42  ;;  %3734 = vmatpush3.bf16.msra.mxu1 %v3731_v38  ;;  %3463 = vmatmul.mubr.f32.gmra.mrb[18].mxu0 %v2014_v52  ;;  %v2023_v18 = vsub.f32 %v5230_v0, %v5715_v30 }
 0x161   :  { %v5255_v51 = vand.u32 4294901760, %v4087_v4  ;;  %3736 = vmatprep.subr.bf16.mxu1 %v4883_v14  ;;  %v1066_v33 = vand.u32 4294901760, %v1065_v44  ;;  %v5721_v48 = vand.u32 4294901760, %v5244_v29 }
 0x162   :  { %3926 = vmatpush3.bf16.msra.mxu0 %v3923_v6  ;;  %v5259_v24 = vand.u32 4294901760, %v4088_v5  ;;  %v499_v37 = vpop.f32.mrb[14].mxu1  ;;  %v2024_v1 = vand.u32 4294901760, %v2023_v18  ;;  %v5719_v38 = vand.u32 4294901760, %v5250_v56 }
 0x163   :  { %3928 = vmatprep.subr.bf16.mxu0 %v4911_v61  ;;  %v5264_v58 = vsub.f32 %v4087_v4, %v5255_v51  ;;  %v4089_v52 = vadd.f32 %v888_v9, %v499_v37  ;;  %v501_v42 = vpop.f32.mrb[15].mxu1  ;;  %3201 = vmatprep.mubr.f32.mxu1 %v1066_v33  ;;  %v1075_v6 = vsub.f32 %v5244_v29, %v5721_v48 }
 0x164   :  { %v5270_v44 = vsub.f32 %v4088_v5, %v5259_v24  ;;  %v4090_v30 = vadd.f32 %v890_v21, %v501_v42  ;;  %3738 = vmatpush3.bf16.msra.mxu1 %v4883_v14  ;;  %3465 = vmatprep.mubr.f32.mxu0 %v2024_v1  ;;  %v2033_v18 = vsub.f32 %v5250_v56, %v5719_v38  ;;  %v5837_v38 = vld [vmem:[#allocation29_spill] sm:$0xff] }
 0x165   :  { %v5276_v4 = vand.u32 4294901760, %v4089_v52  ;;  %3740 = vmatprep.subr.bf16.mxu1 %v4924_v59  ;;  %v1076_v37 = vand.u32 4294901760, %v1075_v6  ;;  %v5720_v9 = vand.u32 4294901760, %v5264_v58 }
 0x166   :  { %3930 = vmatpush3.bf16.msra.mxu0 %v4911_v61  ;;  %v5281_v33 = vand.u32 4294901760, %v4090_v30  ;;  %v2034_v5 = vand.u32 4294901760, %v2033_v18  ;;  %v5718_v14 = vand.u32 4294901760, %v5270_v44 }
 0x167   :  { %3932 = vmatprep.subr.bf16.mxu0 %v4946_v55  ;;  %v5286_v21 = vsub.f32 %v4089_v52, %v5276_v4  ;;  %3202 = vmatmul.mubr.f32.gmra.mrb[20].mxu1 %v1076_v37  ;;  %v1085_v61 = vsub.f32 %v5264_v58, %v5720_v9  ;;  %v5838_v9 = vand.u32 4294901760, %v5837_v38 }
 0x168   :  { %v5292_v1 = vsub.f32 %v4090_v30, %v5281_v33  ;;  %3742 = vmatpush3.bf16.msra.mxu1 %v4924_v59  ;;  %3466 = vmatmul.mubr.f32.gmra.mrb[20].mxu0 %v2034_v5  ;;  %v2043_v42 = vsub.f32 %v5270_v44, %v5718_v14 }
 0x169   :  { %3744 = vmatprep.subr.bf16.mxu1 %v4972_v60  ;;  %v1086_v52 = vand.u32 4294901760, %v1085_v61  ;;  %v5717_v6 = vand.u32 4294901760, %v5286_v21  ;;  %v5813_v61 = vld [vmem:[#allocation12_spill] sm:$0xff] }
 0x16a   :  { %3934 = vmatpush3.bf16.msra.mxu0 %v4946_v55  ;;  %v2044_v18 = vand.u32 4294901760, %v2043_v42  ;;  %v5716_v30 = vand.u32 4294901760, %v5292_v1  ;;  %v5814_v42 = vld [vmem:[#allocation15_spill] sm:$0xff] }
 0x16b   :  { %3936 = vmatprep.subr.bf16.mxu0 %v4987_v35  ;;  %3204 = vmatprep.mubr.f32.mxu1 %v1086_v52  ;;  %v1095_v59 = vsub.f32 %v5286_v21, %v5717_v6  ;;  %v5815_v52 = vld [vmem:[#allocation59_spill] sm:$0xff]  ;;  %v5835_v6 = vld [vmem:[#allocation28_spill] sm:$0xff] }
 0x16c   :  { %3746 = vmatpush3.bf16.msra.mxu1 %v4972_v60  ;;  %3468 = vmatprep.mubr.f32.mxu0 %v2044_v18  ;;  %v2053_v55 = vsub.f32 %v5292_v1, %v5716_v30  ;;  %v3759_v60 = vpack.c.bf16 %v5081_v26, %v5076_v27  ;;  %v5816_v18 = vld [vmem:[#allocation14_spill] sm:$0xff]  ;;  %v5834_v30 = vld [vmem:[#allocation31_spill] sm:$0xff]  ;;  %v5836_v14 = vand.u32 4294901760, %v5835_v6  ;;  %v5843_v6 = vand.u32 4294901760, %v5091_v25 }
 0x16d   :  { %3748 = vmatprep.subr.bf16.mxu1 %v5006_v8  ;;  %v1096_v37 = vand.u32 4294901760, %v1095_v59  ;;  %v5817_v59 = vld [vmem:[#allocation17_spill] sm:$0xff] }
 0x16e   :  { %3938 = vmatpush3.bf16.msra.mxu0 %v4987_v35  ;;  %v2054_v5 = vand.u32 4294901760, %v2053_v55  ;;  %v3763_v35 = vpack.c.bf16 %v5111_v45, %v5106_v47  ;;  %v5818_v55 = vld [vmem:[#allocation16_spill] sm:$0xff]  ;;  %v4011_v48 = vpack.c.bf16 %v5838_v9, %v5836_v14  ;;  %v5844_v9 = vand.u32 4294901760, %v5187_v50 }
 0x16f   :  { %3940 = vmatprep.subr.bf16.mxu0 %v5016_v41  ;;  %3205 = vmatmul.mubr.f32.gmra.mrb[22].mxu1 %v1096_v37  ;;  %v5819_v37 = vld [vmem:[#allocation18_spill] sm:$0xff]  ;;  %v5847_v14 = vand.u32 4294901760, %v5111_v45  ;;  %v5853_v45 = vand.u32 4294901760, %v5208_v40 }
 0x170   :  { %3750 = vmatpush3.bf16.msra.mxu1 %v5006_v8  ;;  %3239 = vmatprep.mubr.f32.mxu1 %v5119_v10  ;;  %v3955_v8 = vpack.c.bf16 %v5132_v12, %v5124_v34 }
 0x171   :  { %3469 = vmatmul.mubr.f32.gmra.mrb[22].mxu0 %v2054_v5  ;;  %3752 = vmatprep.subr.bf16.mxu1 %v5021_v49  ;;  %v5820_v5 = vld [vmem:[#allocation19_spill] sm:$0xff] }
 0x172   :  { %3942 = vmatpush3.bf16.msra.mxu0 %v5016_v41  ;;  %3503 = vmatprep.mubr.f32.mxu0 %v5126_v39  ;;  %v3951_v41 = vpack.c.bf16 %v5091_v25, %v5086_v31  ;;  %v5850_v25 = vand.u32 4294901760, %v5124_v34 }
 0x173   :  { %3944 = vmatprep.subr.bf16.mxu0 %v5027_v3 }
 0x174   :  { %3754 = vmatpush3.bf16.msra.mxu1 %v5021_v49  ;;  %v5805_v49 = vld [vmem:[#allocation52_spill] sm:$0xff] }
 0x175   :  { %3756 = vmatprep.subr.bf16.mxu1 %v5025_v2 }
 0x176   :  { %3946 = vmatpush3.bf16.msra.mxu0 %v5027_v3  ;;  %v5807_v3 = vld [vmem:[#allocation54_spill] sm:$0xff] }
 0x177   :  { %3240 = vmatmul.mubr.f32.vlgmr.msra.gmra.mrb[16].mxu1 %v5141_v28  ;;  %3948 = vmatprep.subr.bf16.mxu0 %v5031_v63 }
 0x178   :  { %3242 = vmatprep.mubr.f32.mxu1 %v5172_v7  ;;  %3758 = vmatpush3.bf16.msra.mxu1 %v5025_v2  ;;  %v5806_v2 = vld [vmem:[#allocation53_spill] sm:$0xff] }
 0x179   :  { %3504 = vmatmul.mubr.f32.vlgmr.msra.gmra.mrb[16].mxu0 %v5147_v16  ;;  %3760 = vmatprep.subr.bf16.mxu1 %v3759_v60 }
 0x17a   :  { %3506 = vmatprep.mubr.f32.mxu0 %v5178_v57  ;;  %3950 = vmatpush3.bf16.msra.mxu0 %v5031_v63  ;;  %v5808_v63 = vld [vmem:[#allocation55_spill] sm:$0xff] }
 0x17b   :  { %3243 = vmatmul.mubr.f32.gmra.mrb[18].mxu1 %v5195_v46  ;;  %3952 = vmatprep.subr.bf16.mxu0 %v3951_v41 }
 0x17c   :  { %3245 = vmatprep.mubr.f32.mxu1 %v5214_v32  ;;  %3762 = vmatpush3.bf16.msra.mxu1 %v3759_v60  ;;  %v5821_v60 = vand.u32 4294901760, %v5135_v20 }
 0x17d   :  { %3507 = vmatmul.mubr.f32.gmra.mrb[18].mxu0 %v5198_v23  ;;  %3764 = vmatprep.subr.bf16.mxu1 %v3763_v35 }
 0x17e   :  { %3509 = vmatprep.mubr.f32.mxu0 %v5219_v17  ;;  %3954 = vmatpush3.bf16.msra.mxu0 %v3951_v41  ;;  %v5822_v41 = vld [vmem:[#allocation20_spill] sm:$0xff] }
 0x17f   :  { %3246 = vmatmul.mubr.f32.gmra.mrb[20].mxu1 %v5236_v62  ;;  %3956 = vmatprep.subr.bf16.mxu0 %v3955_v8 }
 0x180   :  { %3248 = vmatprep.mubr.f32.mxu1 %v5255_v51  ;;  %3766 = vmatpush3.bf16.msra.mxu1 %v3763_v35  ;;  %v5823_v35 = vand.u32 4294901760, %v5139_v15 }
 0x181   :  { %3510 = vmatmul.mubr.f32.gmra.mrb[20].mxu0 %v5240_v22  ;;  %3768 = vmatprep.subr.bf16.mxu1 %v5035_v13 }
 0x182   :  { %3512 = vmatprep.mubr.f32.mxu0 %v5259_v24  ;;  %3958 = vmatpush3.bf16.msra.mxu0 %v3955_v8  ;;  %v5824_v8 = vld [vmem:[#allocation21_spill] sm:$0xff] }
 0x183   :  { %3249 = vmatmul.mubr.f32.gmra.mrb[22].mxu1 %v5276_v4  ;;  %3960 = vmatprep.subr.bf16.mxu0 %v5039_v53 }
 0x184   :  { %3770 = vmatpush3.bf16.msra.mxu1 %v5035_v13  ;;  %3283 = vmatprep.mubr.f32.mxu1 %v5135_v20  ;;  %v5809_v13 = vld [vmem:[#allocation56_spill] sm:$0xff] }
 0x185   :  { %3513 = vmatmul.mubr.f32.gmra.mrb[22].mxu0 %v5281_v33  ;;  %3772 = vmatprep.subr.bf16.mxu1 %v5043_v11  ;;  %v5827_v20 = vld [vmem:[#allocation24_spill] sm:$0xff] }
 0x186   :  { %3962 = vmatpush3.bf16.msra.mxu0 %v5039_v53  ;;  %3547 = vmatprep.mubr.f32.mxu0 %v5139_v15  ;;  %v5810_v53 = vld [vmem:[#allocation57_spill] sm:$0xff]  ;;  %v5829_v15 = vld [vmem:[#allocation30_spill] sm:$0xff] }
 0x187   :  { %3964 = vmatprep.subr.bf16.mxu0 %v5047_v36 }
 0x188   :  { %3774 = vmatpush3.bf16.msra.mxu1 %v5043_v11  ;;  %v5811_v11 = vld [vmem:[#allocation13_spill] sm:$0xff] }
 0x189   :  { %3776 = vmatprep.subr.bf16.mxu1 %v5805_v49 }
 0x18a   :  { %3966 = vmatpush3.bf16.msra.mxu0 %v5047_v36  ;;  %v5812_v36 = vld [vmem:[#allocation58_spill] sm:$0xff] }
 0x18b   :  { %3968 = vmatprep.subr.bf16.mxu0 %v5806_v2 }
 0x18c   :  { %3778 = vmatpush3.bf16.msra.mxu1 %v5805_v49  ;;  %v5825_v49 = vld [vmem:[#allocation22_spill] sm:$0xff] }
 0x18d   :  { %3780 = vmatprep.subr.bf16.mxu1 %v5807_v3 }
 0x18e   :  { %3970 = vmatpush3.bf16.msra.mxu0 %v5806_v2  ;;  %v5826_v2 = vld [vmem:[#allocation23_spill] sm:$0xff] }
 0x18f   :  { %3972 = vmatprep.subr.bf16.mxu0 %v5808_v63 }
 0x190   :  { %3782 = vmatpush3.bf16.msra.mxu1 %v5807_v3  ;;  %v5828_v3 = vld [vmem:[#allocation27_spill] sm:$0xff] }
 0x191   :  { %3784 = vmatprep.subr.bf16.mxu1 %v5809_v13 }
 0x192   :  { %3974 = vmatpush3.bf16.msra.mxu0 %v5808_v63  ;;  %v5830_v63 = vld [vmem:[#allocation25_spill] sm:$0xff] }
 0x193   :  { %3976 = vmatprep.subr.bf16.mxu0 %v5810_v53 }
 0x194   :  { %3786 = vmatpush3.bf16.msra.mxu1 %v5809_v13  ;;  %v5831_v13 = vand.u32 4294901760, %v5830_v63 }
 0x195   :  { %3788 = vmatprep.subr.bf16.mxu1 %v5811_v11 }
 0x196   :  { %3978 = vmatpush3.bf16.msra.mxu0 %v5810_v53  ;;  %v5832_v53 = vld [vmem:[#allocation26_spill] sm:$0xff] }
 0x197   :  { %3284 = vmatmul.mubr.f32.vlgmr.msra.gmra.mrb[16].mxu1 %v5812_v36  ;;  %3980 = vmatprep.subr.bf16.mxu0 %v5813_v61 }
 0x198   :  { %3286 = vmatprep.mubr.f32.mxu1 %v5187_v50  ;;  %3790 = vmatpush3.bf16.msra.mxu1 %v5811_v11  ;;  %v5851_v50 = vand.u32 4294901760, %v5132_v12  ;;  %v5859_v12 = vand.u32 4294901760, %v5244_v29 }
 0x199   :  { %3548 = vmatmul.mubr.f32.vlgmr.msra.gmra.mrb[16].mxu0 %v5164_v43  ;;  %3792 = vmatprep.subr.bf16.mxu1 %v5814_v42 }
 0x19a   :  { %3550 = vmatprep.mubr.f32.mxu0 %v5815_v52  ;;  %3982 = vmatpush3.bf16.msra.mxu0 %v5813_v61 }
 0x19b   :  { %3287 = vmatmul.mubr.f32.gmra.mrb[18].mxu1 %v5202_v54  ;;  %3984 = vmatprep.subr.bf16.mxu0 %v5816_v18 }
 0x19c   :  { %3289 = vmatprep.mubr.f32.mxu1 %v5224_v19  ;;  %3794 = vmatpush3.bf16.msra.mxu1 %v5814_v42 }
 0x19d   :  { %3551 = vmatmul.mubr.f32.gmra.mrb[18].mxu0 %v5208_v40  ;;  %3796 = vmatprep.subr.bf16.mxu1 %v5817_v59 }
 0x19e   :  { %3553 = vmatprep.mubr.f32.mxu0 %v5230_v0  ;;  %3986 = vmatpush3.bf16.msra.mxu0 %v5816_v18 }
 0x19f   :  { %3290 = vmatmul.mubr.f32.gmra.mrb[20].mxu1 %v5244_v29  ;;  %3988 = vmatprep.subr.bf16.mxu0 %v5818_v55 }
 0x1a0   :  { %3292 = vmatprep.mubr.f32.mxu1 %v5264_v58  ;;  %3798 = vmatpush3.bf16.msra.mxu1 %v5817_v59 }
 0x1a1   :  { %3554 = vmatmul.mubr.f32.gmra.mrb[20].mxu0 %v5250_v56  ;;  %3800 = vmatprep.subr.bf16.mxu1 %v5819_v37 }
 0x1a2   :  { %3556 = vmatprep.mubr.f32.mxu0 %v5270_v44  ;;  %3990 = vmatpush3.bf16.msra.mxu0 %v5818_v55 }
 0x1a3   :  { %3293 = vmatmul.mubr.f32.gmra.mrb[22].mxu1 %v5286_v21  ;;  %3992 = vmatprep.subr.bf16.mxu0 %v5820_v5 }
 0x1a4   :  { %3802 = vmatpush3.bf16.msra.mxu1 %v5819_v37  ;;  %3327 = vmatprep.mubr.f32.mxu1 %v5821_v60  ;;  %v5833_v60 = vand.u32 4294901760, %v5832_v53  ;;  %v5842_v53 = vand.u32 4294901760, %v5086_v31  ;;  %v5849_v31 = vand.u32 4294901760, %v5202_v54 }
 0x1a5   :  { %3557 = vmatmul.mubr.f32.gmra.mrb[22].mxu0 %v5292_v1  ;;  %3804 = vmatprep.subr.bf16.mxu1 %v5822_v41 }
 0x1a6   :  { %3994 = vmatpush3.bf16.msra.mxu0 %v5820_v5  ;;  %3591 = vmatprep.mubr.f32.mxu0 %v5823_v35  ;;  %v3819_v35 = vpack.c.bf16 %v5833_v60, %v5831_v13  ;;  %v5841_v13 = vand.u32 4294901760, %v5812_v36  ;;  %v4015_v38 = vpack.c.bf16 %v5843_v6, %v5842_v53  ;;  %v5864_v53 = vand.u32 4294901760, %v5264_v58  ;;  %v5872_v58 = vld [vmem:[#allocation38_spill] sm:$0xff] }
 0x1a7   :  { %3996 = vmatprep.subr.bf16.mxu0 %v5824_v8  ;;  %v5865_v6 = vand.u32 4294901760, %v5250_v56 }
 0x1a8   :  { %3806 = vmatpush3.bf16.msra.mxu1 %v5822_v41 }
 0x1a9   :  { %3808 = vmatprep.subr.bf16.mxu1 %v5825_v49 }
 0x1aa   :  { %3998 = vmatpush3.bf16.msra.mxu0 %v5824_v8 }
 0x1ab   :  { %4000 = vmatprep.subr.bf16.mxu0 %v5826_v2 }
 0x1ac   :  { %3810 = vmatpush3.bf16.msra.mxu1 %v5825_v49 }
 0x1ad   :  { %3812 = vmatprep.subr.bf16.mxu1 %v5827_v20 }
 0x1ae   :  { %4002 = vmatpush3.bf16.msra.mxu0 %v5826_v2  ;;  %v5840_v2 = vand.u32 4294901760, %v5081_v26  ;;  %v5846_v26 = vand.u32 4294901760, %v5106_v47  ;;  %v5854_v47 = vld [vmem:[#allocation32_spill] sm:$0xff] }
 0x1af   :  { %4004 = vmatprep.subr.bf16.mxu0 %v5828_v3 }
 0x1b0   :  { %3814 = vmatpush3.bf16.msra.mxu1 %v5827_v20  ;;  %v5839_v20 = vand.u32 4294901760, %v5076_v27  ;;  %v5845_v27 = vand.u32 4294901760, %v5164_v43  ;;  %v3827_v36 = vpack.c.bf16 %v5847_v14, %v5846_v26  ;;  %v4019_v43 = vpack.c.bf16 %v5851_v50, %v5850_v25  ;;  %v5877_v50 = vld [vmem:[#allocation40_spill] sm:$0xff] }
 0x1b1   :  { %3816 = vmatprep.subr.bf16.mxu1 %v5829_v15  ;;  %v5870_v26 = vand.u32 4294901760, %v5270_v44  ;;  %v5871_v14 = vand.u32 4294901760, %v5286_v21  ;;  %v5876_v25 = vand.u32 4294901760, %v5292_v1  ;;  %v5878_v44 = vand.u32 4294901760, %v5877_v50  ;;  %v5881_v21 = vld [vmem:[#allocation42_spill] sm:$0xff] }
 0x1b2   :  { %4006 = vmatpush3.bf16.msra.mxu0 %v5828_v3  ;;  %v3823_v63 = vpack.c.bf16 %v5840_v2, %v5839_v20  ;;  %v5848_v2 = vand.u32 4294901760, %v5815_v52  ;;  %v5852_v20 = vand.u32 4294901760, %v5224_v19  ;;  %v5855_v52 = vand.u32 4294901760, %v5854_v47  ;;  %v5860_v19 = vld [vmem:[#allocation34_spill] sm:$0xff] }
 0x1b3   :  { %4008 = vmatprep.subr.bf16.mxu0 %v5834_v30  ;;  %v5861_v34 = vand.u32 4294901760, %v5860_v19  ;;  %v5882_v47 = vand.u32 4294901760, %v5881_v21 }
 0x1b4   :  { %3818 = vmatpush3.bf16.msra.mxu1 %v5829_v15 }
 0x1b5   :  { %3820 = vmatprep.subr.bf16.mxu1 %v3819_v35 }
 0x1b6   :  { %4010 = vmatpush3.bf16.msra.mxu0 %v5834_v30 }
 0x1b7   :  { %3328 = vmatmul.mubr.f32.vlgmr.msra.gmra.mrb[16].mxu1 %v5841_v13  ;;  %4012 = vmatprep.subr.bf16.mxu0 %v4011_v48 }
 0x1b8   :  { %3330 = vmatprep.mubr.f32.mxu1 %v5844_v9  ;;  %3822 = vmatpush3.bf16.msra.mxu1 %v3819_v35  ;;  %v5858_v35 = vand.u32 4294901760, %v5230_v0  ;;  %v5866_v0 = vld [vmem:[#allocation36_spill] sm:$0xff] }
 0x1b9   :  { %3592 = vmatmul.mubr.f32.vlgmr.msra.gmra.mrb[16].mxu0 %v5845_v27  ;;  %3824 = vmatprep.subr.bf16.mxu1 %v3823_v63  ;;  %v5867_v9 = vand.u32 4294901760, %v5866_v0 }
 0x1ba   :  { %3594 = vmatprep.mubr.f32.mxu0 %v5848_v2  ;;  %4014 = vmatpush3.bf16.msra.mxu0 %v4011_v48  ;;  %v5856_v48 = vld [vmem:[#allocation33_spill] sm:$0xff]  ;;  %v5873_v2 = vand.u32 4294901760, %v5872_v58 }
 0x1bb   :  { %3331 = vmatmul.mubr.f32.gmra.mrb[18].mxu1 %v5849_v31  ;;  %4016 = vmatprep.subr.bf16.mxu0 %v4015_v38  ;;  %v5857_v60 = vand.u32 4294901760, %v5856_v48 }
 0x1bc   :  { %3333 = vmatprep.mubr.f32.mxu1 %v5852_v20  ;;  %3826 = vmatpush3.bf16.msra.mxu1 %v3823_v63  ;;  %v5862_v63 = vld [vmem:[#allocation35_spill] sm:$0xff]  ;;  %v5879_v20 = vld [vmem:[#allocation41_spill] sm:$0xff] }
 0x1bd   :  { %3595 = vmatmul.mubr.f32.gmra.mrb[18].mxu0 %v5853_v45  ;;  %3828 = vmatprep.subr.bf16.mxu1 %v3827_v36  ;;  %v3831_v54 = vpack.c.bf16 %v5857_v60, %v5855_v52  ;;  %v5863_v13 = vand.u32 4294901760, %v5862_v63  ;;  %v5883_v52 = vld [vmem:[#allocation43_spill] sm:$0xff] }
 0x1be   :  { %3597 = vmatprep.mubr.f32.mxu0 %v5858_v35  ;;  %4018 = vmatpush3.bf16.msra.mxu0 %v4015_v38  ;;  %v5868_v38 = vld [vmem:[#allocation37_spill] sm:$0xff]  ;;  %v5884_v48 = vand.u32 4294901760, %v5883_v52 }
 0x1bf   :  { %3334 = vmatmul.mubr.f32.gmra.mrb[20].mxu1 %v5859_v12  ;;  %4020 = vmatprep.subr.bf16.mxu0 %v4019_v43  ;;  %v4023_v40 = vpack.c.bf16 %v5863_v13, %v5861_v34  ;;  %v5869_v27 = vand.u32 4294901760, %v5868_v38  ;;  %v5887_v35 = vld [vmem:[#allocation45_spill] sm:$0xff]  ;;  %v5889_v34 = vld [vmem:[#allocation46_spill] sm:$0xff]  ;;  %v5891_v13 = vld [vmem:[#allocation47_spill] sm:$0xff] }
 0x1c0   :  { %3336 = vmatprep.mubr.f32.mxu1 %v5864_v53  ;;  %3830 = vmatpush3.bf16.msra.mxu1 %v3827_v36  ;;  %v5874_v36 = vld [vmem:[#allocation39_spill] sm:$0xff]  ;;  %v4031_v60 = vpack.c.bf16 %v5884_v48, %v5882_v47  ;;  %v5888_v12 = vand.u32 4294901760, %v5887_v35  ;;  %v5890_v63 = vand.u32 4294901760, %v5889_v34 }
 0x1c1   :  { %3598 = vmatmul.mubr.f32.gmra.mrb[20].mxu0 %v5865_v6  ;;  %3832 = vmatprep.subr.bf16.mxu1 %v3831_v54  ;;  %v3835_v29 = vpack.c.bf16 %v5869_v27, %v5867_v9  ;;  %v5875_v31 = vand.u32 4294901760, %v5874_v36  ;;  %v5893_v6 = vld [vmem:[#allocation48_spill] sm:$0xff]  ;;  %v5895_v9 = vld [vmem:[#allocation49_spill] sm:$0xff] }
 0x1c2   :  { %3600 = vmatprep.mubr.f32.mxu0 %v5870_v26  ;;  %4022 = vmatpush3.bf16.msra.mxu0 %v4019_v43  ;;  %v5880_v43 = vand.u32 4294901760, %v5879_v20  ;;  %v5894_v0 = vand.u32 4294901760, %v5893_v6  ;;  %v5896_v38 = vand.u32 4294901760, %v5895_v9 }
 0x1c3   :  { %3337 = vmatmul.mubr.f32.gmra.mrb[22].mxu1 %v5871_v14  ;;  %4024 = vmatprep.subr.bf16.mxu0 %v4023_v40  ;;  %v4027_v56 = vpack.c.bf16 %v5875_v31, %v5873_v2  ;;  %v5899_v14 = vld [vmem:[#allocation51_spill] sm:$0xff] }
 0x1c4   :  { %3834 = vmatpush3.bf16.msra.mxu1 %v3831_v54  ;;  %3371 = vmatprep.mubr.f32.mxu1 %v5119_v10  ;;  %v3839_v45 = vpack.c.bf16 %v5880_v43, %v5878_v44  ;;  %v5885_v54 = vld [vmem:[#allocation44_spill] sm:$0xff]  ;;  %v3847_v27 = vpack.c.bf16 %v5896_v38, %v5894_v0  ;;  %v5900_v58 = vand.u32 4294901760, %v5899_v14 }
 0x1c5   :  { %3601 = vmatmul.mubr.f32.gmra.mrb[22].mxu0 %v5876_v25  ;;  %3836 = vmatprep.subr.bf16.mxu1 %v3835_v29  ;;  %v5886_v1 = vand.u32 4294901760, %v5885_v54 }
 0x1c6   :  { %4026 = vmatpush3.bf16.msra.mxu0 %v4023_v40  ;;  %3635 = vmatprep.mubr.f32.mxu0 %v5126_v39  ;;  %v5892_v40 = vand.u32 4294901760, %v5891_v13 }
 0x1c7   :  { %4028 = vmatprep.subr.bf16.mxu0 %v4027_v56  ;;  %v3843_v19 = vpack.c.bf16 %v5888_v12, %v5886_v1 }
 0x1c8   :  { %3838 = vmatpush3.bf16.msra.mxu1 %v3835_v29  ;;  %v4035_v53 = vpack.c.bf16 %v5892_v40, %v5890_v63  ;;  %v5897_v29 = vld [vmem:[#allocation50_spill] sm:$0xff] }
 0x1c9   :  { %3840 = vmatprep.subr.bf16.mxu1 %v3839_v45  ;;  %v5898_v26 = vand.u32 4294901760, %v5897_v29 }
 0x1ca   :  { %4030 = vmatpush3.bf16.msra.mxu0 %v4027_v56 }
 0x1cb   :  { %4032 = vmatprep.subr.bf16.mxu0 %v4031_v60  ;;  %v4039_v2 = vpack.c.bf16 %v5900_v58, %v5898_v26 }
 0x1cc   :  { %3842 = vmatpush3.bf16.msra.mxu1 %v3839_v45 }
 0x1cd   :  { %3844 = vmatprep.subr.bf16.mxu1 %v3843_v19 }
 0x1ce   :  { %4034 = vmatpush3.bf16.msra.mxu0 %v4031_v60 }
 0x1cf   :  { %4036 = vmatprep.subr.bf16.mxu0 %v4035_v53 }
 0x1d0   :  { %3846 = vmatpush3.bf16.msra.mxu1 %v3843_v19 }
 0x1d1   :  { %3848 = vmatprep.subr.bf16.mxu1 %v3847_v27 }
 0x1d2   :  { %4038 = vmatpush3.bf16.msra.mxu0 %v4035_v53 }
 0x1d3   :  { %4040 = vmatprep.subr.bf16.mxu0 %v4039_v2 }
 0x1d4   :  { %3850 = vmatpush3.bf16.msra.mxu1 %v3847_v27 }
 0x1d5   :  { %3852 = vmatprep.subr.bf16.mxu1 %v5811_v11 }
 0x1d6   :  { %4042 = vmatpush3.bf16.msra.mxu0 %v4039_v2 }
 0x1d7   :  { %3372 = vmatmul.mubr.f32.vlgmr.msra.gmra.mrb[16].mxu1 %v5141_v28  ;;  %4044 = vmatprep.subr.bf16.mxu0 %v5813_v61 }
 0x1d8   :  { %3374 = vmatprep.mubr.f32.mxu1 %v5172_v7  ;;  %3854 = vmatpush3.bf16.msra.mxu1 %v5811_v11  ;;  %v5901_v11 = vld [vmem:[#allocation23_spill] sm:$0xff] }
 0x1d9   :  { %3636 = vmatmul.mubr.f32.vlgmr.msra.gmra.mrb[16].mxu0 %v5147_v16  ;;  %3856 = vmatprep.subr.bf16.mxu1 %v5814_v42 }
 0x1da   :  { %3638 = vmatprep.mubr.f32.mxu0 %v5178_v57  ;;  %4046 = vmatpush3.bf16.msra.mxu0 %v5813_v61 }
 0x1db   :  { %3375 = vmatmul.mubr.f32.gmra.mrb[18].mxu1 %v5195_v46  ;;  %4048 = vmatprep.subr.bf16.mxu0 %v5816_v18 }
 0x1dc   :  { %3377 = vmatprep.mubr.f32.mxu1 %v5214_v32  ;;  %3858 = vmatpush3.bf16.msra.mxu1 %v5814_v42 }
 0x1dd   :  { %3639 = vmatmul.mubr.f32.gmra.mrb[18].mxu0 %v5198_v23  ;;  %3860 = vmatprep.subr.bf16.mxu1 %v5817_v59 }
 0x1de   :  { %3641 = vmatprep.mubr.f32.mxu0 %v5219_v17  ;;  %4050 = vmatpush3.bf16.msra.mxu0 %v5816_v18 }
 0x1df   :  { %3378 = vmatmul.mubr.f32.gmra.mrb[20].mxu1 %v5236_v62  ;;  %4052 = vmatprep.subr.bf16.mxu0 %v5818_v55 }
 0x1e0   :  { %3380 = vmatprep.mubr.f32.mxu1 %v5255_v51  ;;  %3862 = vmatpush3.bf16.msra.mxu1 %v5817_v59 }
 0x1e1   :  { %3642 = vmatmul.mubr.f32.gmra.mrb[20].mxu0 %v5240_v22  ;;  %3864 = vmatprep.subr.bf16.mxu1 %v5819_v37 }
 0x1e2   :  { %3644 = vmatprep.mubr.f32.mxu0 %v5259_v24  ;;  %4054 = vmatpush3.bf16.msra.mxu0 %v5818_v55 }
 0x1e3   :  { %3381 = vmatmul.mubr.f32.gmra.mrb[22].mxu1 %v5276_v4  ;;  %4056 = vmatprep.subr.bf16.mxu0 %v5820_v5 }
 0x1e4   :  { %3866 = vmatpush3.bf16.msra.mxu1 %v5819_v37  ;;  %3415 = vmatprep.mubr.f32.mxu1 %v5119_v10  ;;  %v5902_v10 = vld [vmem:[#allocation24_spill] sm:$0xff] }
 0x1e5   :  { %3645 = vmatmul.mubr.f32.gmra.mrb[22].mxu0 %v5281_v33  ;;  %3868 = vmatprep.subr.bf16.mxu1 %v5822_v41 }
 0x1e6   :  { %4058 = vmatpush3.bf16.msra.mxu0 %v5820_v5  ;;  %3679 = vmatprep.mubr.f32.mxu0 %v5126_v39 }
 0x1e7   :  { %4060 = vmatprep.subr.bf16.mxu0 %v5824_v8 }
 0x1e8   :  { %3870 = vmatpush3.bf16.msra.mxu1 %v5822_v41 }
 0x1e9   :  { %3872 = vmatprep.subr.bf16.mxu1 %v5825_v49 }
 0x1ea   :  { %4062 = vmatpush3.bf16.msra.mxu0 %v5824_v8 }
 0x1eb   :  { %4064 = vmatprep.subr.bf16.mxu0 %v5901_v11 }
 0x1ec   :  { %3874 = vmatpush3.bf16.msra.mxu1 %v5825_v49 }
 0x1ed   :  { %3876 = vmatprep.subr.bf16.mxu1 %v5902_v10 }
 0x1ee   :  { %4066 = vmatpush3.bf16.msra.mxu0 %v5901_v11 }
 0x1ef   :  { %4068 = vmatprep.subr.bf16.mxu0 %v5828_v3 }
 0x1f0   :  { %3878 = vmatpush3.bf16.msra.mxu1 %v5902_v10 }
 0x1f1   :  { %3880 = vmatprep.subr.bf16.mxu1 %v5829_v15 }
 0x1f2   :  { %4070 = vmatpush3.bf16.msra.mxu0 %v5828_v3 }
 0x1f3   :  { %4072 = vmatprep.subr.bf16.mxu0 %v5834_v30 }
 0x1f4   :  { %3882 = vmatpush3.bf16.msra.mxu1 %v5829_v15 }
 0x1f6   :  { %4074 = vmatpush3.bf16.msra.mxu0 %v5834_v30 }
 0x1f7   :  { %3416 = vmatmul.mubr.f32.vlgmr.msra.gmra.mrb[16].mxu1 %v5141_v28 }
 0x1f8   :  { %3418 = vmatprep.mubr.f32.mxu1 %v5172_v7 }
 0x1f9   :  { %3680 = vmatmul.mubr.f32.vlgmr.msra.gmra.mrb[16].mxu0 %v5147_v16 }
 0x1fa   :  { %3682 = vmatprep.mubr.f32.mxu0 %v5178_v57 }
 0x1fb   :  { %3419 = vmatmul.mubr.f32.gmra.mrb[18].mxu1 %v5195_v46 }
 0x1fc   :  { %3421 = vmatprep.mubr.f32.mxu1 %v5214_v32 }
 0x1fd   :  { %3683 = vmatmul.mubr.f32.gmra.mrb[18].mxu0 %v5198_v23 }
 0x1fe   :  { %3685 = vmatprep.mubr.f32.mxu0 %v5219_v17 }
 0x1ff   :  { %3422 = vmatmul.mubr.f32.gmra.mrb[20].mxu1 %v5236_v62 }
 0x200   :  { %3424 = vmatprep.mubr.f32.mxu1 %v5255_v51 }
 0x201   :  { %3686 = vmatmul.mubr.f32.gmra.mrb[20].mxu0 %v5240_v22 }
 0x202   :  { %3688 = vmatprep.mubr.f32.mxu0 %v5259_v24 }
 0x203   :  { %3425 = vmatmul.mubr.f32.gmra.mrb[22].mxu1 %v5276_v4 }
 0x205   :  { %3689 = vmatmul.mubr.f32.gmra.mrb[22].mxu0 %v5281_v33 }
 0x2ca   :  { %v3417_v39 = vpop.f32.mrb[16].mxu1 }
 0x2cb   :  { %v1837_v28 = vpop.f32.mrb[17].mxu1 }
 0x2cc   :  { %v3681_v16 = vpop.f32.mrb[16].mxu0 }
 0x2cd   :  { %v2842_v46 = vmul.f32 %v3681_v16, %v3417_v39  ;;  %v2795_v7 = vpop.f32.mrb[17].mxu0 }
 0x2ce   :  { %v2841_v23 = vmul.f32 %v2795_v7, %v1837_v28  ;;  %v3420_v57 = vpop.f32.mrb[18].mxu1 }
 0x2cf   :  { %2850 = vst [vmem:[#allocation8 + $0x8] sm:$0xff] %v2842_v46  ;;  %v1849_v32 = vpop.f32.mrb[19].mxu1 }
 0x2d0   :  { %2849 = vst [vmem:[#allocation8] sm:$0xff] %v2841_v23  ;;  %v3684_v17 = vpop.f32.mrb[18].mxu0 }
 0x2d1   :  { %v2844_v62 = vmul.f32 %v3684_v17, %v3420_v57  ;;  %v2807_v51 = vpop.f32.mrb[19].mxu0 }
 0x2d2   :  { %v2843_v22 = vmul.f32 %v2807_v51, %v1849_v32  ;;  %v3423_v30 = vpop.f32.mrb[20].mxu1 }
 0x2d3   :  { %2852 = vst [vmem:[#allocation8 + $0x18] sm:$0xff] %v2844_v62  ;;  %v1861_v24 = vpop.f32.mrb[21].mxu1 }
 0x2d4   :  { %2851 = vst [vmem:[#allocation8 + $0x10] sm:$0xff] %v2843_v22  ;;  %v3687_v4 = vpop.f32.mrb[20].mxu0 }
 0x2d5   :  { %v2846_v33 = vmul.f32 %v3687_v4, %v3423_v30  ;;  %v2819_v61 = vpop.f32.mrb[21].mxu0 }
 0x2d6   :  { %v2845_v42 = vmul.f32 %v2819_v61, %v1861_v24  ;;  %v3426_v18 = vpop.f32.mrb[22].mxu1 }
 0x2d7   :  { %2854 = vst [vmem:[#allocation8 + $0x28] sm:$0xff] %v2846_v33  ;;  %v1873_v59 = vpop.f32.mrb[23].mxu1 }
 0x2d8   :  { %2853 = vst [vmem:[#allocation8 + $0x20] sm:$0xff] %v2845_v42  ;;  %v3690_v55 = vpop.f32.mrb[22].mxu0 }
 0x2d9   :  { %v2848_v37 = vmul.f32 %v3690_v55, %v3426_v18  ;;  %v2831_v5 = vpop.f32.mrb[23].mxu0 }
 0x2da   :  { %v2847_v41 = vmul.f32 %v2831_v5, %v1873_v59 }
 0x2db   :  { %2856 = vst [vmem:[#allocation8 + $0x38] sm:$0xff] %v2848_v37 }
 0x2dc   :  { %2855 = vst [vmem:[#allocation8 + $0x30] sm:$0xff] %v2847_v41 }
 0x2dd   :  { %4296 = shalt.err (!%p4293_p6)
}
 0x2de   :  { %s4297_s12 = scalar_lea.hbm %s5594_s4, 1024 }
 0x2df   :  { %p4298_p7 = scmp.ne.s32.totalorder %s5594_s4, %s4297_s12  ;;  %p4301_p8 = scmp.lt.u32.totalorder %s4297_s12, %s5594_s4 }
 0x2e1   :  { %p4303_p9 = pnand %p4301_p8, %p4298_p7 }
 0x2e3   :  { %4306 = shalt.err (!%p4303_p9)
}
 0x2e4   :  { %2868 = dma.vmem_to_hbm [thread:$0]  %s2863_s8, 1024, %s5594_s4, [#allocation5], %s4314_s25, %s4314_s25, %s4315_s26  }
 0x2e5   :  { %4311 = dma.done.wait [#allocation5], 1024  }
 0x2e6   :  { %4312 = vsyncadd [#allocation5], 4294966272 }
 0x2e7   :  { %2872 = vsyncpa [#allocation4], 1 }
 0x2e8   :  { %2873 = vsyncpa [#allocation7], 1 }
 0x2e9   :  { %2874 = vsyncpa [#allocation5], 1 }

</bundles_post_ra>
